<compile_context>
chip_gen: v7x
topology: tpu7x:2x2x1
jax: 0.10.0
libtpu: 0.0.40
codegen_flags: <defaults>
</compile_context>

<pallas_src>
import numpy as np
import jax
import jax.numpy as jnp
from jax.experimental import pallas as pl
from jax.experimental.pallas import tpu as pltpu


def episodic_memory_kernel(facts_ref, q_ref, m_ref, wh_ref, wg_ref, b_ref, out_ref):
  facts = facts_ref[...]                      # (B, S, H)
  q = q_ref[...]                              # (B, H)
  m = m_ref[...]                              # (B, H)
  B, S, H = facts.shape
  BS = B * S

  b = b_ref[...]                              # (6, H) packed bias/row buffer
  z1_b = b[0:1, :]
  z2_row = b[1:2, :]                          # z2 weight as a (1, H) row
  r_bias = b[2:3, :]                          # wr_b + ur_b (pre-combined on host)
  w_b = b[3:4, :]
  u_b = b[4:5, :]
  nm_b = b[5:6, :]

  qe = q[:, None, :]
  me = m[:, None, :]

  # Interaction features -> z1: four partial matmuls against (H, H) sublane-slices of
  # z1_w instead of building a 4H-lane concatenated vector (no lane shifts at H=32).
  fq = (facts * qe).reshape(BS, H)
  fm = (facts * me).reshape(BS, H)
  dq = jnp.abs(facts - qe).reshape(BS, H)
  dm = jnp.abs(facts - me).reshape(BS, H)
  z1_pre = (jnp.dot(fq, wh_ref[0 * H:1 * H, :], preferred_element_type=jnp.float32)
            + jnp.dot(fm, wh_ref[1 * H:2 * H, :], preferred_element_type=jnp.float32)
            + jnp.dot(dq, wh_ref[2 * H:3 * H, :], preferred_element_type=jnp.float32)
            + jnp.dot(dm, wh_ref[3 * H:4 * H, :], preferred_element_type=jnp.float32)
            + z1_b)
  g1 = jnp.tanh(z1_pre)                       # (BS, H)

  # z2 projection as VPU multiply + lane reduce (no 1-wide MXU matmul, no (BS,1) relayout).
  # z2's scalar bias is uniform over all logits and cancels in softmax, so it is omitted.
  logits = jnp.sum((g1 * z2_row).reshape(B, S, H), axis=-1)     # (B, S)
  mx = jnp.max(logits, axis=-1, keepdims=True)
  e = jnp.exp(logits - mx)
  G = e / jnp.sum(e, axis=-1, keepdims=True)                    # (B, S)

  # Hoisted fact-side GRU matmul for all S steps (off the recurrent critical path):
  # one fused facts @ [Wr | W] matmul, biases folded in after the split.
  wf = wg_ref[0:H, :]                         # (H, 2H)  [Wr | W]   (sublane-aligned view)
  wu = wg_ref[H:2 * H, :]                     # (H, 2H)  [Ur | U]   (sublane-aligned view)
  facts2d = facts.reshape(BS, H)
  fact_rh = jnp.dot(facts2d, wf, preferred_element_type=jnp.float32)  # (BS, 2H)
  fact_r_all = (fact_rh[:, :H] + r_bias).reshape(B, S, H)
  fact_h_all = (fact_rh[:, H:] + w_b).reshape(B, S, H)

  u_bb = jnp.broadcast_to(u_b, (B, H))        # hoisted broadcast
  g_all = jnp.broadcast_to(G[:, :, None], (B, S, H))            # hoisted gate broadcast

  # next_mem parts independent of C, computed before the serial loop.
  base = (jnp.dot(m, wh_ref[4 * H:5 * H, :], preferred_element_type=jnp.float32)
          + jnp.dot(q, wh_ref[6 * H:7 * H, :], preferred_element_type=jnp.float32)
          + nm_b)

  # Attention-GRU over sentences: one fused recurrent matmul per step.
  # S=8 is small, so keep the Python unroll (would switch to lax.fori_loop for large S).
  C = jnp.zeros((B, H), jnp.float32)
  for sid in range(S):
    cu = jnp.dot(C, wu, preferred_element_type=jnp.float32)     # (B, 2H) = [C@Ur | C@U]
    r = jax.nn.sigmoid(fact_r_all[:, sid, :] + cu[:, :H])
    h_tilda = jnp.tanh(fact_h_all[:, sid, :] + r * (cu[:, H:] + u_bb))
    g = g_all[:, sid, :]
    C = g * h_tilda + (1.0 - g) * C

  # next_mem = relu(m@Wm + q@Wq + nm_b + C@Wc)  (only the C term is on the serial tail)
  nm = base + jnp.dot(C, wh_ref[5 * H:6 * H, :], preferred_element_type=jnp.float32)
  out_ref[...] = jnp.maximum(nm, 0.0)


def pack_params(p):
  """Pack the 14 weight/bias arrays into 3 contiguous buffers (fewer, bigger DMAs)."""
  H = p['wr_w'].shape[0]
  wh = jnp.concatenate([
      p['z1_w'],                 # rows 0:4H   z1 weight (4 (H,H) slices used separately)
      p['nm_w'][0:H],            # rows 4H:5H  next_mem block for prevM
      p['nm_w'][H:2 * H],        # rows 5H:6H  next_mem block for C
      p['nm_w'][2 * H:3 * H],    # rows 6H:7H  next_mem block for questions
  ], axis=0)                                           # (7H, H)
  wg = jnp.concatenate([
      jnp.concatenate([p['wr_w'], p['w_w']], axis=1),  # rows 0:H   fused fact weight [Wr|W]
      jnp.concatenate([p['ur_w'], p['u_w']], axis=1),  # rows H:2H  fused recurrent [Ur|U]
  ], axis=0)                                           # (2H, 2H)
  bias = jnp.concatenate([
      p['z1_b'],
      p['z2_w'].T,               # z2 weight as a (1, H) row (z2 bias cancels in softmax)
      p['wr_b'] + p['ur_b'],     # pre-combined reset-gate bias
      p['w_b'],
      p['u_b'],
      p['nm_b'],
  ], axis=0)                                           # (6, H)
  return wh, wg, bias


def episodic_memory(facts, questions, prevM, params):
  B, S, H = facts.shape
  q = questions.reshape(B, H)
  m = prevM.reshape(B, H)
  wh, wg, bias = pack_params(params)
  inputs = (facts, q, m, wh, wg, bias)
  out = pl.pallas_call(
      episodic_memory_kernel,
      out_shape=jax.ShapeDtypeStruct((B, H), jnp.float32),
      in_specs=[pl.BlockSpec(memory_space=pltpu.MemorySpace.VMEM)] * len(inputs),
      out_specs=pl.BlockSpec(memory_space=pltpu.MemorySpace.VMEM),
  )(*inputs)
  return out[:, None, :]                               # (B, 1, H)


def _xavier_t(key, out_f, in_f):
  """Xavier-normal init of a (out,in) PyTorch Linear weight, returned transposed (in,out)."""
  std = float(np.sqrt(2.0 / (in_f + out_f)))
  w = jax.random.normal(key, (out_f, in_f), jnp.float32) * std
  return w.T


def _bias(key, out_f, in_f):
  bound = 1.0 / float(np.sqrt(in_f))
  return jax.random.uniform(key, (1, out_f), jnp.float32, -bound, bound)


def init_params(key, H):
  ks = jax.random.split(key, 14)
  return {
      'z1_w': _xavier_t(ks[0], H, 4 * H), 'z1_b': _bias(ks[1], H, 4 * H),
      'z2_w': _xavier_t(ks[2], 1, H),     'z2_b': _bias(ks[3], 1, H),
      'wr_w': _xavier_t(ks[4], H, H),     'wr_b': _bias(ks[5], H, H),
      'ur_w': _xavier_t(ks[6], H, H),     'ur_b': _bias(ks[7], H, H),
      'w_w':  _xavier_t(ks[8], H, H),     'w_b':  _bias(ks[9], H, H),
      'u_w':  _xavier_t(ks[10], H, H),    'u_b':  _bias(ks[11], H, H),
      'nm_w': _xavier_t(ks[12], H, 3 * H),'nm_b': _bias(ks[13], H, 3 * H),
  }


def reference(facts, questions, prevM, p):
  """Pure-JAX reference mirroring the PyTorch forward exactly (incl. z2 bias)."""
  B, S, H = facts.shape
  q = questions.reshape(B, H)
  m = prevM.reshape(B, H)
  z = jnp.concatenate([facts * q[:, None], facts * m[:, None],
                       jnp.abs(facts - q[:, None]), jnp.abs(facts - m[:, None])],
                      axis=2).reshape(B * S, 4 * H)
  G = jnp.tanh(z @ p['z1_w'] + p['z1_b'])
  G = (G @ p['z2_w'] + p['z2_b']).reshape(B, S)
  G = jax.nn.softmax(G, axis=-1)
  C = jnp.zeros((B, H), jnp.float32)
  for sid in range(S):
    fact = facts[:, sid, :]
    g = G[:, sid][:, None]
    r = jax.nn.sigmoid(fact @ p['wr_w'] + p['wr_b'] + C @ p['ur_w'] + p['ur_b'])
    h = jnp.tanh(fact @ p['w_w'] + p['w_b'] + r * (C @ p['u_w'] + p['u_b']))
    C = g * h + (1 - g) * C
  concat = jnp.concatenate([m, C, q], axis=1)
  return jax.nn.relu(concat @ p['nm_w'] + p['nm_b'])[:, None, :]


if __name__ == "__main__":
  B, S, H = 2, 8, 32
  key = jax.random.PRNGKey(0)
  k_f, k_q, k_m, k_p = jax.random.split(key, 4)
  facts = jax.random.normal(k_f, (B, S, H), jnp.float32)
  questions = jax.random.normal(k_q, (B, 1, H), jnp.float32)
  prevM = jax.random.normal(k_m, (B, 1, H), jnp.float32)
  params = init_params(k_p, H)

  out = episodic_memory(facts, questions, prevM, params)
  out = jax.block_until_ready(out)

  ref = jax.block_until_ready(reference(facts, questions, prevM, params))
  assert out.shape == (B, 1, H)
  # Slightly looser tolerance than a bit-identical graph: the kernel re-associates the
  # z1 / GRU / next_mem sums (partial matmuls, fused weights, pre-combined biases).
  np.testing.assert_allclose(np.asarray(out), np.asarray(ref), rtol=2e-5, atol=2e-5)
  print("KERNEL_OK")
</pallas_src>

<mosaic_0001>
module attributes {stable_mosaic.version = 11 : i64} {
  func.func @episodic_memory_kernel(%arg0: memref<2x8x32xf32, #tpu.memory_space<vmem>>, %arg1: memref<2x32xf32, #tpu.memory_space<vmem>>, %arg2: memref<2x32xf32, #tpu.memory_space<vmem>>, %arg3: memref<224x32xf32, #tpu.memory_space<vmem>>, %arg4: memref<64x64xf32, #tpu.memory_space<vmem>>, %arg5: memref<6x32xf32, #tpu.memory_space<vmem>>, %arg6: memref<2x32xf32, #tpu.memory_space<vmem>>) attributes {dimension_semantics = [], scalar_prefetch = 0 : i64, scratch_operands = 0 : i64, tpu.core_type = #tpu.core_type<tc>} {
    %c0 = arith.constant 0 : index
    %c0_0 = arith.constant 0 : index
    %c0_1 = arith.constant 0 : index
    %0 = vector.load %arg0[%c0, %c0_0, %c0_1] : memref<2x8x32xf32, #tpu.memory_space<vmem>>, vector<2x8x32xf32>
    %c0_2 = arith.constant 0 : index
    %c0_3 = arith.constant 0 : index
    %1 = vector.load %arg1[%c0_2, %c0_3] : memref<2x32xf32, #tpu.memory_space<vmem>>, vector<2x32xf32>
    %c0_4 = arith.constant 0 : index
    %c0_5 = arith.constant 0 : index
    %2 = vector.load %arg2[%c0_4, %c0_5] : memref<2x32xf32, #tpu.memory_space<vmem>>, vector<2x32xf32>
    %c0_6 = arith.constant 0 : index
    %c0_7 = arith.constant 0 : index
    %3 = vector.load %arg5[%c0_6, %c0_7] : memref<6x32xf32, #tpu.memory_space<vmem>>, vector<6x32xf32>
    %4 = vector.extract_strided_slice %3 {offsets = [0, 0], sizes = [1, 32], strides = [1, 1]} : vector<6x32xf32> to vector<1x32xf32>
    %5 = vector.extract_strided_slice %3 {offsets = [1, 0], sizes = [1, 32], strides = [1, 1]} : vector<6x32xf32> to vector<1x32xf32>
    %6 = vector.extract_strided_slice %3 {offsets = [2, 0], sizes = [1, 32], strides = [1, 1]} : vector<6x32xf32> to vector<1x32xf32>
    %7 = vector.extract_strided_slice %3 {offsets = [3, 0], sizes = [1, 32], strides = [1, 1]} : vector<6x32xf32> to vector<1x32xf32>
    %8 = vector.extract_strided_slice %3 {offsets = [4, 0], sizes = [1, 32], strides = [1, 1]} : vector<6x32xf32> to vector<1x32xf32>
    %9 = vector.extract_strided_slice %3 {offsets = [5, 0], sizes = [1, 32], strides = [1, 1]} : vector<6x32xf32> to vector<1x32xf32>
    %10 = vector.shape_cast %1 : vector<2x32xf32> to vector<2x1x32xf32>
    %11 = vector.shape_cast %2 : vector<2x32xf32> to vector<2x1x32xf32>
    %12 = vector.broadcast %10 : vector<2x1x32xf32> to vector<2x8x32xf32>
    %13 = arith.mulf %0, %12 : vector<2x8x32xf32>
    %14 = vector.shape_cast %13 : vector<2x8x32xf32> to vector<16x32xf32>
    %15 = vector.broadcast %11 : vector<2x1x32xf32> to vector<2x8x32xf32>
    %16 = arith.mulf %0, %15 : vector<2x8x32xf32>
    %17 = vector.shape_cast %16 : vector<2x8x32xf32> to vector<16x32xf32>
    %18 = vector.broadcast %10 : vector<2x1x32xf32> to vector<2x8x32xf32>
    %19 = arith.subf %0, %18 : vector<2x8x32xf32>
    %20 = math.absf %19 : vector<2x8x32xf32>
    %21 = vector.shape_cast %20 : vector<2x8x32xf32> to vector<16x32xf32>
    %22 = vector.broadcast %11 : vector<2x1x32xf32> to vector<2x8x32xf32>
    %23 = arith.subf %0, %22 : vector<2x8x32xf32>
    %24 = math.absf %23 : vector<2x8x32xf32>
    %25 = vector.shape_cast %24 : vector<2x8x32xf32> to vector<16x32xf32>
    %c0_8 = arith.constant 0 : index
    %c0_9 = arith.constant 0 : index
    %26 = vector.load %arg3[%c0_8, %c0_9] : memref<224x32xf32, #tpu.memory_space<vmem>>, vector<32x32xf32>
    %cst = arith.constant dense<0.000000e+00> : vector<16x32xf32>
    %27 = tpu.matmul %14, %26, %cst {dimension_numbers = #tpu.dot_dimension_numbers<[1], [0], [0], [1], [0, 0, 1, 1], [], []>} : vector<16x32xf32>, vector<32x32xf32>, vector<16x32xf32> -> vector<16x32xf32>
    %c32 = arith.constant 32 : index
    %c0_10 = arith.constant 0 : index
    %28 = vector.load %arg3[%c32, %c0_10] : memref<224x32xf32, #tpu.memory_space<vmem>>, vector<32x32xf32>
    %cst_11 = arith.constant dense<0.000000e+00> : vector<16x32xf32>
    %29 = tpu.matmul %17, %28, %cst_11 {dimension_numbers = #tpu.dot_dimension_numbers<[1], [0], [0], [1], [0, 0, 1, 1], [], []>} : vector<16x32xf32>, vector<32x32xf32>, vector<16x32xf32> -> vector<16x32xf32>
    %30 = arith.addf %27, %29 : vector<16x32xf32>
    %c64 = arith.constant 64 : index
    %c0_12 = arith.constant 0 : index
    %31 = vector.load %arg3[%c64, %c0_12] : memref<224x32xf32, #tpu.memory_space<vmem>>, vector<32x32xf32>
    %cst_13 = arith.constant dense<0.000000e+00> : vector<16x32xf32>
    %32 = tpu.matmul %21, %31, %cst_13 {dimension_numbers = #tpu.dot_dimension_numbers<[1], [0], [0], [1], [0, 0, 1, 1], [], []>} : vector<16x32xf32>, vector<32x32xf32>, vector<16x32xf32> -> vector<16x32xf32>
    %33 = arith.addf %30, %32 : vector<16x32xf32>
    %c96 = arith.constant 96 : index
    %c0_14 = arith.constant 0 : index
    %34 = vector.load %arg3[%c96, %c0_14] : memref<224x32xf32, #tpu.memory_space<vmem>>, vector<32x32xf32>
    %cst_15 = arith.constant dense<0.000000e+00> : vector<16x32xf32>
    %35 = tpu.matmul %25, %34, %cst_15 {dimension_numbers = #tpu.dot_dimension_numbers<[1], [0], [0], [1], [0, 0, 1, 1], [], []>} : vector<16x32xf32>, vector<32x32xf32>, vector<16x32xf32> -> vector<16x32xf32>
    %36 = arith.addf %33, %35 : vector<16x32xf32>
    %37 = vector.broadcast %4 : vector<1x32xf32> to vector<16x32xf32>
    %38 = arith.addf %36, %37 : vector<16x32xf32>
    %39 = math.tanh %38 : vector<16x32xf32>
    %40 = vector.broadcast %5 : vector<1x32xf32> to vector<16x32xf32>
    %41 = arith.mulf %39, %40 : vector<16x32xf32>
    %42 = vector.shape_cast %41 : vector<16x32xf32> to vector<2x8x32xf32>
    %cst_16 = arith.constant dense<0.000000e+00> : vector<2x8xf32>
    %43 = vector.multi_reduction <add>, %42, %cst_16 [2] : vector<2x8x32xf32> to vector<2x8xf32>
    %cst_17 = arith.constant dense<0xFF800000> : vector<2xf32>
    %44 = vector.multi_reduction <maximumf>, %43, %cst_17 [1] : vector<2x8xf32> to vector<2xf32>
    %45 = vector.shape_cast %44 : vector<2xf32> to vector<2x1xf32>
    %46 = vector.broadcast %45 : vector<2x1xf32> to vector<2x8xf32>
    %47 = arith.subf %43, %46 : vector<2x8xf32>
    %48 = math.exp %47 : vector<2x8xf32>
    %cst_18 = arith.constant dense<0.000000e+00> : vector<2xf32>
    %49 = vector.multi_reduction <add>, %48, %cst_18 [1] : vector<2x8xf32> to vector<2xf32>
    %50 = vector.shape_cast %49 : vector<2xf32> to vector<2x1xf32>
    %51 = vector.broadcast %50 : vector<2x1xf32> to vector<2x8xf32>
    %52 = arith.divf %48, %51 : vector<2x8xf32>
    %c0_19 = arith.constant 0 : index
    %c0_20 = arith.constant 0 : index
    %53 = vector.load %arg4[%c0_19, %c0_20] : memref<64x64xf32, #tpu.memory_space<vmem>>, vector<32x64xf32>
    %c32_21 = arith.constant 32 : index
    %c0_22 = arith.constant 0 : index
    %54 = vector.load %arg4[%c32_21, %c0_22] : memref<64x64xf32, #tpu.memory_space<vmem>>, vector<32x64xf32>
    %55 = vector.shape_cast %0 : vector<2x8x32xf32> to vector<16x32xf32>
    %cst_23 = arith.constant dense<0.000000e+00> : vector<16x64xf32>
    %56 = tpu.matmul %55, %53, %cst_23 {dimension_numbers = #tpu.dot_dimension_numbers<[1], [0], [0], [1], [0, 0, 1, 1], [], []>} : vector<16x32xf32>, vector<32x64xf32>, vector<16x64xf32> -> vector<16x64xf32>
    %57 = vector.extract_strided_slice %56 {offsets = [0, 0], sizes = [16, 32], strides = [1, 1]} : vector<16x64xf32> to vector<16x32xf32>
    %58 = vector.broadcast %6 : vector<1x32xf32> to vector<16x32xf32>
    %59 = arith.addf %57, %58 : vector<16x32xf32>
    %60 = vector.shape_cast %59 : vector<16x32xf32> to vector<2x8x32xf32>
    %61 = vector.extract_strided_slice %56 {offsets = [0, 32], sizes = [16, 32], strides = [1, 1]} : vector<16x64xf32> to vector<16x32xf32>
    %62 = vector.broadcast %7 : vector<1x32xf32> to vector<16x32xf32>
    %63 = arith.addf %61, %62 : vector<16x32xf32>
    %64 = vector.shape_cast %63 : vector<16x32xf32> to vector<2x8x32xf32>
    %65 = vector.shape_cast %8 : vector<1x32xf32> to vector<1x32xf32>
    %66 = vector.broadcast %65 : vector<1x32xf32> to vector<2x32xf32>
    %67 = vector.shape_cast %52 : vector<2x8xf32> to vector<2x8x1xf32>
    %68 = vector.shape_cast %67 : vector<2x8x1xf32> to vector<2x8x1xf32>
    %69 = vector.broadcast %68 : vector<2x8x1xf32> to vector<2x8x32xf32>
    %c128 = arith.constant 128 : index
    %c0_24 = arith.constant 0 : index
    %70 = vector.load %arg3[%c128, %c0_24] : memref<224x32xf32, #tpu.memory_space<vmem>>, vector<32x32xf32>
    %cst_25 = arith.constant dense<0.000000e+00> : vector<2x32xf32>
    %71 = tpu.matmul %2, %70, %cst_25 {dimension_numbers = #tpu.dot_dimension_numbers<[1], [0], [0], [1], [0, 0, 1, 1], [], []>} : vector<2x32xf32>, vector<32x32xf32>, vector<2x32xf32> -> vector<2x32xf32>
    %c192 = arith.constant 192 : index
    %c0_26 = arith.constant 0 : index
    %72 = vector.load %arg3[%c192, %c0_26] : memref<224x32xf32, #tpu.memory_space<vmem>>, vector<32x32xf32>
    %cst_27 = arith.constant dense<0.000000e+00> : vector<2x32xf32>
    %73 = tpu.matmul %1, %72, %cst_27 {dimension_numbers = #tpu.dot_dimension_numbers<[1], [0], [0], [1], [0, 0, 1, 1], [], []>} : vector<2x32xf32>, vector<32x32xf32>, vector<2x32xf32> -> vector<2x32xf32>
    %74 = arith.addf %71, %73 : vector<2x32xf32>
    %75 = vector.broadcast %9 : vector<1x32xf32> to vector<2x32xf32>
    %76 = arith.addf %74, %75 : vector<2x32xf32>
    %cst_28 = arith.constant 0.000000e+00 : f32
    %77 = vector.broadcast %cst_28 : f32 to vector<2x32xf32>
    %cst_29 = arith.constant dense<0.000000e+00> : vector<2x64xf32>
    %78 = tpu.matmul %77, %54, %cst_29 {dimension_numbers = #tpu.dot_dimension_numbers<[1], [0], [0], [1], [0, 0, 1, 1], [], []>} : vector<2x32xf32>, vector<32x64xf32>, vector<2x64xf32> -> vector<2x64xf32>
    %79 = vector.extract_strided_slice %60 {offsets = [0, 0, 0], sizes = [2, 1, 32], strides = [1, 1, 1]} : vector<2x8x32xf32> to vector<2x1x32xf32>
    %80 = vector.shape_cast %79 : vector<2x1x32xf32> to vector<2x32xf32>
    %81 = vector.extract_strided_slice %78 {offsets = [0, 0], sizes = [2, 32], strides = [1, 1]} : vector<2x64xf32> to vector<2x32xf32>
    %82 = arith.addf %80, %81 : vector<2x32xf32>
    %83 = arith.negf %82 : vector<2x32xf32>
    %84 = math.exp %83 : vector<2x32xf32>
    %cst_30 = arith.constant 1.000000e+00 : f32
    %85 = vector.broadcast %cst_30 : f32 to vector<2x32xf32>
    %86 = arith.addf %85, %84 : vector<2x32xf32>
    %87 = arith.divf %85, %86 : vector<2x32xf32>
    %88 = vector.extract_strided_slice %64 {offsets = [0, 0, 0], sizes = [2, 1, 32], strides = [1, 1, 1]} : vector<2x8x32xf32> to vector<2x1x32xf32>
    %89 = vector.shape_cast %88 : vector<2x1x32xf32> to vector<2x32xf32>
    %90 = vector.extract_strided_slice %78 {offsets = [0, 32], sizes = [2, 32], strides = [1, 1]} : vector<2x64xf32> to vector<2x32xf32>
    %91 = arith.addf %90, %66 : vector<2x32xf32>
    %92 = arith.mulf %87, %91 : vector<2x32xf32>
    %93 = arith.addf %89, %92 : vector<2x32xf32>
    %94 = math.tanh %93 : vector<2x32xf32>
    %95 = vector.extract_strided_slice %69 {offsets = [0, 0, 0], sizes = [2, 1, 32], strides = [1, 1, 1]} : vector<2x8x32xf32> to vector<2x1x32xf32>
    %96 = vector.shape_cast %95 : vector<2x1x32xf32> to vector<2x32xf32>
    %97 = arith.mulf %96, %94 : vector<2x32xf32>
    %cst_31 = arith.constant 1.000000e+00 : f32
    %98 = vector.broadcast %cst_31 : f32 to vector<2x32xf32>
    %99 = arith.subf %98, %96 : vector<2x32xf32>
    %100 = arith.mulf %99, %77 : vector<2x32xf32>
    %101 = arith.addf %97, %100 : vector<2x32xf32>
    %cst_32 = arith.constant dense<0.000000e+00> : vector<2x64xf32>
    %102 = tpu.matmul %101, %54, %cst_32 {dimension_numbers = #tpu.dot_dimension_numbers<[1], [0], [0], [1], [0, 0, 1, 1], [], []>} : vector<2x32xf32>, vector<32x64xf32>, vector<2x64xf32> -> vector<2x64xf32>
    %103 = vector.extract_strided_slice %60 {offsets = [0, 1, 0], sizes = [2, 1, 32], strides = [1, 1, 1]} : vector<2x8x32xf32> to vector<2x1x32xf32>
    %104 = vector.shape_cast %103 : vector<2x1x32xf32> to vector<2x32xf32>
    %105 = vector.extract_strided_slice %102 {offsets = [0, 0], sizes = [2, 32], strides = [1, 1]} : vector<2x64xf32> to vector<2x32xf32>
    %106 = arith.addf %104, %105 : vector<2x32xf32>
    %107 = arith.negf %106 : vector<2x32xf32>
    %108 = math.exp %107 : vector<2x32xf32>
    %cst_33 = arith.constant 1.000000e+00 : f32
    %109 = vector.broadcast %cst_33 : f32 to vector<2x32xf32>
    %110 = arith.addf %109, %108 : vector<2x32xf32>
    %111 = arith.divf %109, %110 : vector<2x32xf32>
    %112 = vector.extract_strided_slice %64 {offsets = [0, 1, 0], sizes = [2, 1, 32], strides = [1, 1, 1]} : vector<2x8x32xf32> to vector<2x1x32xf32>
    %113 = vector.shape_cast %112 : vector<2x1x32xf32> to vector<2x32xf32>
    %114 = vector.extract_strided_slice %102 {offsets = [0, 32], sizes = [2, 32], strides = [1, 1]} : vector<2x64xf32> to vector<2x32xf32>
    %115 = arith.addf %114, %66 : vector<2x32xf32>
    %116 = arith.mulf %111, %115 : vector<2x32xf32>
    %117 = arith.addf %113, %116 : vector<2x32xf32>
    %118 = math.tanh %117 : vector<2x32xf32>
    %119 = vector.extract_strided_slice %69 {offsets = [0, 1, 0], sizes = [2, 1, 32], strides = [1, 1, 1]} : vector<2x8x32xf32> to vector<2x1x32xf32>
    %120 = vector.shape_cast %119 : vector<2x1x32xf32> to vector<2x32xf32>
    %121 = arith.mulf %120, %118 : vector<2x32xf32>
    %cst_34 = arith.constant 1.000000e+00 : f32
    %122 = vector.broadcast %cst_34 : f32 to vector<2x32xf32>
    %123 = arith.subf %122, %120 : vector<2x32xf32>
    %124 = arith.mulf %123, %101 : vector<2x32xf32>
    %125 = arith.addf %121, %124 : vector<2x32xf32>
    %cst_35 = arith.constant dense<0.000000e+00> : vector<2x64xf32>
    %126 = tpu.matmul %125, %54, %cst_35 {dimension_numbers = #tpu.dot_dimension_numbers<[1], [0], [0], [1], [0, 0, 1, 1], [], []>} : vector<2x32xf32>, vector<32x64xf32>, vector<2x64xf32> -> vector<2x64xf32>
    %127 = vector.extract_strided_slice %60 {offsets = [0, 2, 0], sizes = [2, 1, 32], strides = [1, 1, 1]} : vector<2x8x32xf32> to vector<2x1x32xf32>
    %128 = vector.shape_cast %127 : vector<2x1x32xf32> to vector<2x32xf32>
    %129 = vector.extract_strided_slice %126 {offsets = [0, 0], sizes = [2, 32], strides = [1, 1]} : vector<2x64xf32> to vector<2x32xf32>
    %130 = arith.addf %128, %129 : vector<2x32xf32>
    %131 = arith.negf %130 : vector<2x32xf32>
    %132 = math.exp %131 : vector<2x32xf32>
    %cst_36 = arith.constant 1.000000e+00 : f32
    %133 = vector.broadcast %cst_36 : f32 to vector<2x32xf32>
    %134 = arith.addf %133, %132 : vector<2x32xf32>
    %135 = arith.divf %133, %134 : vector<2x32xf32>
    %136 = vector.extract_strided_slice %64 {offsets = [0, 2, 0], sizes = [2, 1, 32], strides = [1, 1, 1]} : vector<2x8x32xf32> to vector<2x1x32xf32>
    %137 = vector.shape_cast %136 : vector<2x1x32xf32> to vector<2x32xf32>
    %138 = vector.extract_strided_slice %126 {offsets = [0, 32], sizes = [2, 32], strides = [1, 1]} : vector<2x64xf32> to vector<2x32xf32>
    %139 = arith.addf %138, %66 : vector<2x32xf32>
    %140 = arith.mulf %135, %139 : vector<2x32xf32>
    %141 = arith.addf %137, %140 : vector<2x32xf32>
    %142 = math.tanh %141 : vector<2x32xf32>
    %143 = vector.extract_strided_slice %69 {offsets = [0, 2, 0], sizes = [2, 1, 32], strides = [1, 1, 1]} : vector<2x8x32xf32> to vector<2x1x32xf32>
    %144 = vector.shape_cast %143 : vector<2x1x32xf32> to vector<2x32xf32>
    %145 = arith.mulf %144, %142 : vector<2x32xf32>
    %cst_37 = arith.constant 1.000000e+00 : f32
    %146 = vector.broadcast %cst_37 : f32 to vector<2x32xf32>
    %147 = arith.subf %146, %144 : vector<2x32xf32>
    %148 = arith.mulf %147, %125 : vector<2x32xf32>
    %149 = arith.addf %145, %148 : vector<2x32xf32>
    %cst_38 = arith.constant dense<0.000000e+00> : vector<2x64xf32>
    %150 = tpu.matmul %149, %54, %cst_38 {dimension_numbers = #tpu.dot_dimension_numbers<[1], [0], [0], [1], [0, 0, 1, 1], [], []>} : vector<2x32xf32>, vector<32x64xf32>, vector<2x64xf32> -> vector<2x64xf32>
    %151 = vector.extract_strided_slice %60 {offsets = [0, 3, 0], sizes = [2, 1, 32], strides = [1, 1, 1]} : vector<2x8x32xf32> to vector<2x1x32xf32>
    %152 = vector.shape_cast %151 : vector<2x1x32xf32> to vector<2x32xf32>
    %153 = vector.extract_strided_slice %150 {offsets = [0, 0], sizes = [2, 32], strides = [1, 1]} : vector<2x64xf32> to vector<2x32xf32>
    %154 = arith.addf %152, %153 : vector<2x32xf32>
    %155 = arith.negf %154 : vector<2x32xf32>
    %156 = math.exp %155 : vector<2x32xf32>
    %cst_39 = arith.constant 1.000000e+00 : f32
    %157 = vector.broadcast %cst_39 : f32 to vector<2x32xf32>
    %158 = arith.addf %157, %156 : vector<2x32xf32>
    %159 = arith.divf %157, %158 : vector<2x32xf32>
    %160 = vector.extract_strided_slice %64 {offsets = [0, 3, 0], sizes = [2, 1, 32], strides = [1, 1, 1]} : vector<2x8x32xf32> to vector<2x1x32xf32>
    %161 = vector.shape_cast %160 : vector<2x1x32xf32> to vector<2x32xf32>
    %162 = vector.extract_strided_slice %150 {offsets = [0, 32], sizes = [2, 32], strides = [1, 1]} : vector<2x64xf32> to vector<2x32xf32>
    %163 = arith.addf %162, %66 : vector<2x32xf32>
    %164 = arith.mulf %159, %163 : vector<2x32xf32>
    %165 = arith.addf %161, %164 : vector<2x32xf32>
    %166 = math.tanh %165 : vector<2x32xf32>
    %167 = vector.extract_strided_slice %69 {offsets = [0, 3, 0], sizes = [2, 1, 32], strides = [1, 1, 1]} : vector<2x8x32xf32> to vector<2x1x32xf32>
    %168 = vector.shape_cast %167 : vector<2x1x32xf32> to vector<2x32xf32>
    %169 = arith.mulf %168, %166 : vector<2x32xf32>
    %cst_40 = arith.constant 1.000000e+00 : f32
    %170 = vector.broadcast %cst_40 : f32 to vector<2x32xf32>
    %171 = arith.subf %170, %168 : vector<2x32xf32>
    %172 = arith.mulf %171, %149 : vector<2x32xf32>
    %173 = arith.addf %169, %172 : vector<2x32xf32>
    %cst_41 = arith.constant dense<0.000000e+00> : vector<2x64xf32>
    %174 = tpu.matmul %173, %54, %cst_41 {dimension_numbers = #tpu.dot_dimension_numbers<[1], [0], [0], [1], [0, 0, 1, 1], [], []>} : vector<2x32xf32>, vector<32x64xf32>, vector<2x64xf32> -> vector<2x64xf32>
    %175 = vector.extract_strided_slice %60 {offsets = [0, 4, 0], sizes = [2, 1, 32], strides = [1, 1, 1]} : vector<2x8x32xf32> to vector<2x1x32xf32>
    %176 = vector.shape_cast %175 : vector<2x1x32xf32> to vector<2x32xf32>
    %177 = vector.extract_strided_slice %174 {offsets = [0, 0], sizes = [2, 32], strides = [1, 1]} : vector<2x64xf32> to vector<2x32xf32>
    %178 = arith.addf %176, %177 : vector<2x32xf32>
    %179 = arith.negf %178 : vector<2x32xf32>
    %180 = math.exp %179 : vector<2x32xf32>
    %cst_42 = arith.constant 1.000000e+00 : f32
    %181 = vector.broadcast %cst_42 : f32 to vector<2x32xf32>
    %182 = arith.addf %181, %180 : vector<2x32xf32>
    %183 = arith.divf %181, %182 : vector<2x32xf32>
    %184 = vector.extract_strided_slice %64 {offsets = [0, 4, 0], sizes = [2, 1, 32], strides = [1, 1, 1]} : vector<2x8x32xf32> to vector<2x1x32xf32>
    %185 = vector.shape_cast %184 : vector<2x1x32xf32> to vector<2x32xf32>
    %186 = vector.extract_strided_slice %174 {offsets = [0, 32], sizes = [2, 32], strides = [1, 1]} : vector<2x64xf32> to vector<2x32xf32>
    %187 = arith.addf %186, %66 : vector<2x32xf32>
    %188 = arith.mulf %183, %187 : vector<2x32xf32>
    %189 = arith.addf %185, %188 : vector<2x32xf32>
    %190 = math.tanh %189 : vector<2x32xf32>
    %191 = vector.extract_strided_slice %69 {offsets = [0, 4, 0], sizes = [2, 1, 32], strides = [1, 1, 1]} : vector<2x8x32xf32> to vector<2x1x32xf32>
    %192 = vector.shape_cast %191 : vector<2x1x32xf32> to vector<2x32xf32>
    %193 = arith.mulf %192, %190 : vector<2x32xf32>
    %cst_43 = arith.constant 1.000000e+00 : f32
    %194 = vector.broadcast %cst_43 : f32 to vector<2x32xf32>
    %195 = arith.subf %194, %192 : vector<2x32xf32>
    %196 = arith.mulf %195, %173 : vector<2x32xf32>
    %197 = arith.addf %193, %196 : vector<2x32xf32>
    %cst_44 = arith.constant dense<0.000000e+00> : vector<2x64xf32>
    %198 = tpu.matmul %197, %54, %cst_44 {dimension_numbers = #tpu.dot_dimension_numbers<[1], [0], [0], [1], [0, 0, 1, 1], [], []>} : vector<2x32xf32>, vector<32x64xf32>, vector<2x64xf32> -> vector<2x64xf32>
    %199 = vector.extract_strided_slice %60 {offsets = [0, 5, 0], sizes = [2, 1, 32], strides = [1, 1, 1]} : vector<2x8x32xf32> to vector<2x1x32xf32>
    %200 = vector.shape_cast %199 : vector<2x1x32xf32> to vector<2x32xf32>
    %201 = vector.extract_strided_slice %198 {offsets = [0, 0], sizes = [2, 32], strides = [1, 1]} : vector<2x64xf32> to vector<2x32xf32>
    %202 = arith.addf %200, %201 : vector<2x32xf32>
    %203 = arith.negf %202 : vector<2x32xf32>
    %204 = math.exp %203 : vector<2x32xf32>
    %cst_45 = arith.constant 1.000000e+00 : f32
    %205 = vector.broadcast %cst_45 : f32 to vector<2x32xf32>
    %206 = arith.addf %205, %204 : vector<2x32xf32>
    %207 = arith.divf %205, %206 : vector<2x32xf32>
    %208 = vector.extract_strided_slice %64 {offsets = [0, 5, 0], sizes = [2, 1, 32], strides = [1, 1, 1]} : vector<2x8x32xf32> to vector<2x1x32xf32>
    %209 = vector.shape_cast %208 : vector<2x1x32xf32> to vector<2x32xf32>
    %210 = vector.extract_strided_slice %198 {offsets = [0, 32], sizes = [2, 32], strides = [1, 1]} : vector<2x64xf32> to vector<2x32xf32>
    %211 = arith.addf %210, %66 : vector<2x32xf32>
    %212 = arith.mulf %207, %211 : vector<2x32xf32>
    %213 = arith.addf %209, %212 : vector<2x32xf32>
    %214 = math.tanh %213 : vector<2x32xf32>
    %215 = vector.extract_strided_slice %69 {offsets = [0, 5, 0], sizes = [2, 1, 32], strides = [1, 1, 1]} : vector<2x8x32xf32> to vector<2x1x32xf32>
    %216 = vector.shape_cast %215 : vector<2x1x32xf32> to vector<2x32xf32>
    %217 = arith.mulf %216, %214 : vector<2x32xf32>
    %cst_46 = arith.constant 1.000000e+00 : f32
    %218 = vector.broadcast %cst_46 : f32 to vector<2x32xf32>
    %219 = arith.subf %218, %216 : vector<2x32xf32>
    %220 = arith.mulf %219, %197 : vector<2x32xf32>
    %221 = arith.addf %217, %220 : vector<2x32xf32>
    %cst_47 = arith.constant dense<0.000000e+00> : vector<2x64xf32>
    %222 = tpu.matmul %221, %54, %cst_47 {dimension_numbers = #tpu.dot_dimension_numbers<[1], [0], [0], [1], [0, 0, 1, 1], [], []>} : vector<2x32xf32>, vector<32x64xf32>, vector<2x64xf32> -> vector<2x64xf32>
    %223 = vector.extract_strided_slice %60 {offsets = [0, 6, 0], sizes = [2, 1, 32], strides = [1, 1, 1]} : vector<2x8x32xf32> to vector<2x1x32xf32>
    %224 = vector.shape_cast %223 : vector<2x1x32xf32> to vector<2x32xf32>
    %225 = vector.extract_strided_slice %222 {offsets = [0, 0], sizes = [2, 32], strides = [1, 1]} : vector<2x64xf32> to vector<2x32xf32>
    %226 = arith.addf %224, %225 : vector<2x32xf32>
    %227 = arith.negf %226 : vector<2x32xf32>
    %228 = math.exp %227 : vector<2x32xf32>
    %cst_48 = arith.constant 1.000000e+00 : f32
    %229 = vector.broadcast %cst_48 : f32 to vector<2x32xf32>
    %230 = arith.addf %229, %228 : vector<2x32xf32>
    %231 = arith.divf %229, %230 : vector<2x32xf32>
    %232 = vector.extract_strided_slice %64 {offsets = [0, 6, 0], sizes = [2, 1, 32], strides = [1, 1, 1]} : vector<2x8x32xf32> to vector<2x1x32xf32>
    %233 = vector.shape_cast %232 : vector<2x1x32xf32> to vector<2x32xf32>
    %234 = vector.extract_strided_slice %222 {offsets = [0, 32], sizes = [2, 32], strides = [1, 1]} : vector<2x64xf32> to vector<2x32xf32>
    %235 = arith.addf %234, %66 : vector<2x32xf32>
    %236 = arith.mulf %231, %235 : vector<2x32xf32>
    %237 = arith.addf %233, %236 : vector<2x32xf32>
    %238 = math.tanh %237 : vector<2x32xf32>
    %239 = vector.extract_strided_slice %69 {offsets = [0, 6, 0], sizes = [2, 1, 32], strides = [1, 1, 1]} : vector<2x8x32xf32> to vector<2x1x32xf32>
    %240 = vector.shape_cast %239 : vector<2x1x32xf32> to vector<2x32xf32>
    %241 = arith.mulf %240, %238 : vector<2x32xf32>
    %cst_49 = arith.constant 1.000000e+00 : f32
    %242 = vector.broadcast %cst_49 : f32 to vector<2x32xf32>
    %243 = arith.subf %242, %240 : vector<2x32xf32>
    %244 = arith.mulf %243, %221 : vector<2x32xf32>
    %245 = arith.addf %241, %244 : vector<2x32xf32>
    %cst_50 = arith.constant dense<0.000000e+00> : vector<2x64xf32>
    %246 = tpu.matmul %245, %54, %cst_50 {dimension_numbers = #tpu.dot_dimension_numbers<[1], [0], [0], [1], [0, 0, 1, 1], [], []>} : vector<2x32xf32>, vector<32x64xf32>, vector<2x64xf32> -> vector<2x64xf32>
    %247 = vector.extract_strided_slice %60 {offsets = [0, 7, 0], sizes = [2, 1, 32], strides = [1, 1, 1]} : vector<2x8x32xf32> to vector<2x1x32xf32>
    %248 = vector.shape_cast %247 : vector<2x1x32xf32> to vector<2x32xf32>
    %249 = vector.extract_strided_slice %246 {offsets = [0, 0], sizes = [2, 32], strides = [1, 1]} : vector<2x64xf32> to vector<2x32xf32>
    %250 = arith.addf %248, %249 : vector<2x32xf32>
    %251 = arith.negf %250 : vector<2x32xf32>
    %252 = math.exp %251 : vector<2x32xf32>
    %cst_51 = arith.constant 1.000000e+00 : f32
    %253 = vector.broadcast %cst_51 : f32 to vector<2x32xf32>
    %254 = arith.addf %253, %252 : vector<2x32xf32>
    %255 = arith.divf %253, %254 : vector<2x32xf32>
    %256 = vector.extract_strided_slice %64 {offsets = [0, 7, 0], sizes = [2, 1, 32], strides = [1, 1, 1]} : vector<2x8x32xf32> to vector<2x1x32xf32>
    %257 = vector.shape_cast %256 : vector<2x1x32xf32> to vector<2x32xf32>
    %258 = vector.extract_strided_slice %246 {offsets = [0, 32], sizes = [2, 32], strides = [1, 1]} : vector<2x64xf32> to vector<2x32xf32>
    %259 = arith.addf %258, %66 : vector<2x32xf32>
    %260 = arith.mulf %255, %259 : vector<2x32xf32>
    %261 = arith.addf %257, %260 : vector<2x32xf32>
    %262 = math.tanh %261 : vector<2x32xf32>
    %263 = vector.extract_strided_slice %69 {offsets = [0, 7, 0], sizes = [2, 1, 32], strides = [1, 1, 1]} : vector<2x8x32xf32> to vector<2x1x32xf32>
    %264 = vector.shape_cast %263 : vector<2x1x32xf32> to vector<2x32xf32>
    %265 = arith.mulf %264, %262 : vector<2x32xf32>
    %cst_52 = arith.constant 1.000000e+00 : f32
    %266 = vector.broadcast %cst_52 : f32 to vector<2x32xf32>
    %267 = arith.subf %266, %264 : vector<2x32xf32>
    %268 = arith.mulf %267, %245 : vector<2x32xf32>
    %269 = arith.addf %265, %268 : vector<2x32xf32>
    %c160 = arith.constant 160 : index
    %c0_53 = arith.constant 0 : index
    %270 = vector.load %arg3[%c160, %c0_53] : memref<224x32xf32, #tpu.memory_space<vmem>>, vector<32x32xf32>
    %cst_54 = arith.constant dense<0.000000e+00> : vector<2x32xf32>
    %271 = tpu.matmul %269, %270, %cst_54 {dimension_numbers = #tpu.dot_dimension_numbers<[1], [0], [0], [1], [0, 0, 1, 1], [], []>} : vector<2x32xf32>, vector<32x32xf32>, vector<2x32xf32> -> vector<2x32xf32>
    %272 = arith.addf %76, %271 : vector<2x32xf32>
    %cst_55 = arith.constant 0.000000e+00 : f32
    %273 = vector.broadcast %cst_55 : f32 to vector<2x32xf32>
    %274 = arith.maximumf %272, %273 : vector<2x32xf32>
    %c0_56 = arith.constant 0 : index
    %c0_57 = arith.constant 0 : index
    %275 = vector.load %arg6[%c0_56, %c0_57] : memref<2x32xf32, #tpu.memory_space<vmem>>, vector<2x32xf32>
    tpu.vector_store %arg6[%c0_56, %c0_57], %274 {strides = array<i32>} : memref<2x32xf32, #tpu.memory_space<vmem>>, vector<2x32xf32>,
    return
  }
}

</mosaic_0001>

<bundles_post_ra>
// kernel: tpu_custom_call.1
= control target key start
LH: loop header
LB: loop body
LE: loop exit
PB: predicated region body
PF: predicated region fallthrough
CT: control target
= control target key end

     0   :  { %v33_v3 = vlaneseq  ;;  %v2607_v7 = vmov 1966171168   ;;  %vm115_vm0 = vcmask 261120   ;;  %s3104_s0 = inlined_call_operand.vmem [shape: f32[2,8,32], index: 0, kind: input, shape index: {}]   ;;  %s3105_s1 = inlined_call_operand.vmem [shape: f32[2,32], index: 1, kind: input, shape index: {}]   ;;  %s3106_s2 = inlined_call_operand.vmem [shape: f32[2,32], index: 2, kind: input, shape index: {}]   ;;  %s3107_s3 = inlined_call_operand.vmem [shape: f32[224,32], index: 3, kind: input, shape index: {}]   ;;  %s3108_s4 = inlined_call_operand.vmem [shape: f32[64,64], index: 4, kind: input, shape index: {}]   ;;  %s3109_s5 = inlined_call_operand.vmem [shape: f32[6,32], index: 5, kind: input, shape index: {}]   ;;  %s3110_s6 = inlined_call_operand.hbm [shape: f32[2,32], index: 6, kind: output, shape index: {}]  }
   0x1   :  { %v111_v0 = vld [vmem:[%s3107_s3 + $0x20] sm:$0xff]  ;;  %v112_v1 = vld [vmem:[%s3107_s3 + $0x28] sm:$0xff]  ;;  %v113_v2 = vld [vmem:[%s3107_s3 + $0x30] sm:$0xff]  ;;  %v31_v8 = vunpack.c.l.s4 %v2607_v7 }
   0x2   :  { %v2347_v4 = vpack.c.bf16 %v112_v1, %v111_v0  ;;  %v114_v5 = vld [vmem:[%s3107_s3 + $0x38] sm:$0xff]  ;;  %v2665_v6 = vld [vmem:[%s3104_s0] sm:$0xff]  ;;  %v2668_v10 = vshrl.u32 %v33_v3, 7  ;;  %v108_v12 = vld [vmem:[%s3107_s3 + $0x8] sm:$0xff] }
   0x3   :  { %v2351_v9 = vpack.c.bf16 %v114_v5, %v113_v2  ;;  %v107_v11 = vld [vmem:[%s3107_s3] sm:$0xff]  ;;  %2223 = vmatprep.mubr.msk.f32.mxu1 %vm115_vm0, %v2665_v6  ;;  %v32_v13 = vunpack.c.0.s8 %v31_v8 }
   0x4   :  { %2348 = vmatprep.subr.bf16.mxu0 %v2347_v4  ;;  %v2681_v14 = vld [vmem:[%s3106_s2] sm:$0x3]  ;;  %v2355_v17 = vpack.c.bf16 %v108_v12, %v107_v11  ;;  %v2691_v19 = vsub.s32 0, %v2668_v10 }
   0x5   :  { %2350 = vmatpush3.bf16.msra.mxu0 %v2347_v4  ;;  %v2686_v15 = vld [vmem:[%s3105_s1] sm:$0x3]  ;;  %v35_v16 = vsub.s32 %v32_v13, %v2668_v10 }
   0x6   :  { %2352 = vmatprep.subr.bf16.mxu0 %v2351_v9 }
   0x7   :  { %v59_v18 = vrot.slane %v2681_v14, %v35_v16  ;;  %v36_v20 = vrot.slane %v2686_v15, %v35_v16 }
   0x8   :  { %11 = vsyncpa [#allocation3], 0  ;;  %v2699_v28 = vld [vmem:[%s3104_s0 + $0x8] sm:$0xff]  ;;  %v109_v29 = vld [vmem:[%s3107_s3 + $0x10] sm:$0xff]  ;;  %v2757_v1 = vsub.s32 1, %v2668_v10  ;;  %vm2609_vm1 = vmmov 0  }
   0x9   :  { %2354 = vmatpush3.bf16.msra.mxu0 %v2351_v9  ;;  %v60_v21 = vcombine.high %v59_v18, %v59_v18  ;;  %v67_v22 = vrot.slane %v59_v18, %v35_v16  ;;  %v37_v23 = vcombine.high %v36_v20, %v36_v20  ;;  %v44_v24 = vrot.slane %v36_v20, %v35_v16  ;;  %v110_v30 = vld [vmem:[%s3107_s3 + $0x18] sm:$0xff]  ;;  %v278_v37 = vld [vmem:[%s3107_s3 + $0x40] sm:$0xff]  ;;  %v279_v38 = vld [vmem:[%s3107_s3 + $0x48] sm:$0xff]  ;;  %s2612_s2 = smov 32   ;;  %s2613_s15 = smov 96  }
   0xa   :  { %2356 = vmatprep.subr.bf16.mxu0 %v2355_v17  ;;  %v2359_v36 = vpack.c.bf16 %v110_v30, %v109_v29  ;;  %v2363_v41 = vpack.c.bf16 %v279_v38, %v278_v37  ;;  %v280_v42 = vld [vmem:[%s3107_s3 + $0x50] sm:$0xff]  ;;  %v281_v43 = vld [vmem:[%s3107_s3 + $0x58] sm:$0xff]  ;;  %v365_v47 = vld [vmem:[%s3107_s3 + $0x60] sm:$0xff]  ;;  %v2608_v18 = vmov 0.0|0.0   ;;  %v2610_v20 = vmov 0.0   ;;  %s2614_s24 = smov [#allocation2]  }
   0xb   :  { %v90_v25 = vrot.slane %v67_v22, %v2691_v19  ;;  %v74_v26 = vrot.slane %v60_v21, %v35_v16  ;;  %v78_v27 = vrot.slane %v44_v24, %v2691_v19  ;;  %v51_v33 = vrot.slane %v37_v23, %v35_v16  ;;  %v366_v48 = vld [vmem:[%s3107_s3 + $0x68] sm:$0xff]  ;;  %v367_v52 = vld [vmem:[%s3107_s3 + $0x70] sm:$0xff]  ;;  %v368_v53 = vld [vmem:[%s3107_s3 + $0x78] sm:$0xff]  ;;  %s2042_s25 = sshll.u32 %s2614_s24, 4  ;;  %s2043_s25 = int_to_ptr.vmem [resolvable:$true] %s2042_s25 }
   0xc   :  { %v2367_v46 = vpack.c.bf16 %v281_v43, %v280_v42  ;;  %v2371_v51 = vpack.c.bf16 %v366_v48, %v365_v47  ;;  %v2375_v56 = vpack.c.bf16 %v368_v53, %v367_v52  ;;  %v2752_v59 = vld [vmem:[%s3109_s5] sm:$0x3f]  ;;  %v545_v12 = vld [vmem:[%s3108_s4 + $0x8] sm:$0xff]  ;;  %v546_v13 = vld [vmem:[%s3108_s4 + $0x10] sm:$0xff]  ;;  %vm484_vm2 = vcmask 1041409   ;;  %s2583_s26 = scalar_lea.vmem %s2043_s25, 32  ;;  %p2588_p1 = scmp.lt.s32.totalorder %s2043_s25, %s2043_s25 }
   0xd   :  { %v97_v31 = vmul.f32 %v90_v25, %v2665_v6  ;;  %v94_v32 = vrot.slane %v74_v26, %v2691_v19  ;;  %v85_v34 = vmul.f32 %v78_v27, %v2665_v6  ;;  %v82_v39 = vrot.slane %v51_v33, %v2691_v19  ;;  %v544_v11 = vld [vmem:[%s3108_s4] sm:$0xff]  ;;  %v549_v23 = vld [vmem:[%s3108_s4 + $0x28] sm:$0xff]  ;;  %v551_v29 = vld [vmem:[%s3108_s4 + $0x38] sm:$0xff]  ;;  %p2584_p0 = scmp.ne.s32.totalorder %s2043_s25, %s2583_s26  ;;  %p2589_p2 = scmp.lt.s32.totalorder %s2583_s26, %s2583_s26 }
   0xe   :  { %v99_v40 = vsub.f32 %v2665_v6, %v78_v27  ;;  %v103_v50 = vsub.f32 %v2665_v6, %v90_v25  ;;  %v455_v60 = vrot.slane %v2752_v59, %v2691_v19  ;;  %v463_v2 = vrot.slane %v2752_v59, %v2757_v1  ;;  %v548_v22 = vld [vmem:[%s3108_s4 + $0x20] sm:$0xff]  ;;  %v658_v25 = vld [vmem:[%s3107_s3 + $0xc8] sm:$0xff]  ;;  %v550_v27 = vld [vmem:[%s3108_s4 + $0x30] sm:$0xff] }
   0xf   :  { %2179 = vmatprep.mubr.msk.f32.mxu0 %vm115_vm0, %v97_v31  ;;  %v98_v35 = vmul.f32 %v94_v32, %v2699_v28  ;;  %v86_v44 = vmul.f32 %v82_v39, %v2699_v28  ;;  %v100_v49 = vsub.f32 %v2699_v28, %v82_v39  ;;  %v104_v57 = vsub.f32 %v2699_v28, %v94_v32  ;;  %v657_v24 = vld [vmem:[%s3107_s3 + $0xc0] sm:$0xff]  ;;  %v659_v31 = vld [vmem:[%s3107_s3 + $0xd0] sm:$0xff]  ;;  %v660_v32 = vld [vmem:[%s3107_s3 + $0xd8] sm:$0xff]  ;;  %p2590_p3 = por %p2589_p2, %p2588_p1 }
  0x10   :  { %v101_v45 = vand.u32 2147483647, %v99_v40  ;;  %v105_v55 = vand.u32 2147483647, %v103_v50  ;;  %v2379_v16 = vpack.c.bf16 %v545_v12, %v544_v11  ;;  %v2790_v26 = vpack.c.bf16 %v549_v23, %v548_v22  ;;  %v655_v37 = vld [vmem:[%s3107_s3 + $0x90] sm:$0xff]  ;;  %v656_v38 = vld [vmem:[%s3107_s3 + $0x98] sm:$0xff] }
  0x11   :  { %2180 = vmatmul.mubr.msk.f32.vlgmr.msra.gmra.mrb[0].mxu0 %vm115_vm0, %v98_v35  ;;  %v102_v54 = vand.u32 2147483647, %v100_v49  ;;  %v106_v58 = vand.u32 2147483647, %v104_v57  ;;  %v2388_v30 = vpack.c.bf16 %v658_v25, %v657_v24  ;;  %v2807_v33 = vpack.c.bf16 %v551_v29, %v550_v27  ;;  %v653_v35 = vld [vmem:[%s3107_s3 + $0x80] sm:$0xff]  ;;  %p2591_p4 = pnand %p2590_p3, %p2584_p0 }
  0x12   :  { %2358 = vmatpush3.bf16.msra.mxu0 %v2355_v17  ;;  %2190 = vmatprep.mubr.msk.f32.mxu0 %vm115_vm0, %v85_v34  ;;  %v547_v17 = vld [vmem:[%s3108_s4 + $0x18] sm:$0xff]  ;;  %v2391_v34 = vpack.c.bf16 %v660_v32, %v659_v31  ;;  %v2397_v39 = vpack.c.bf16 %v656_v38, %v655_v37  ;;  %vm487_vm3 = vcmask 58368   ;;  %v651_v53 = vsub.s32 4, %v2668_v10 }
  0x13   :  { %2360 = vmatprep.subr.bf16.mxu0 %v2359_v36  ;;  %v2383_v21 = vpack.c.bf16 %v547_v17, %v546_v13  ;;  %2380 = vmatprep.subr.bf16.mxu1 %v2379_v16  ;;  %v635_v12 = vsub.s32 2, %v2668_v10  ;;  %vm2034_vm4 = vcmask 254976  }
  0x14   :  { %2382 = vmatpush3.bf16.msra.mxu1 %v2379_v16 }
  0x15   :  { %2384 = vmatprep.subr.bf16.mxu1 %v2383_v21  ;;  %v636_v13 = vrot.slane %v2752_v59, %v635_v12 }
  0x16   :  { %2362 = vmatpush3.bf16.msra.mxu0 %v2359_v36  ;;  %v654_v36 = vld [vmem:[%s3107_s3 + $0x88] sm:$0xff] }
  0x17   :  { %2364 = vmatprep.subr.bf16.mxu0 %v2363_v41 }
  0x18   :  { %2386 = vmatpush3.bf16.msra.mxu1 %v2383_v21 }
  0x19   :  { %2191 = vmatmul.mubr.msk.f32.vlgmr.msra.gmra.mrb[0].mxu0 %vm115_vm0, %v86_v44  ;;  %2387 = vmatprep.subr.bf16.mxu1 %v2608_v18 }
  0x1a   :  { %2366 = vmatpush3.bf16.msra.mxu0 %v2363_v41  ;;  %2201 = vmatprep.mubr.msk.f32.mxu0 %vm115_vm0, %v101_v45 }
  0x1b   :  { %2368 = vmatprep.subr.bf16.mxu0 %v2367_v46  ;;  %2224 = vmatmul.mubr.msk.f32.vlgmr.msra.gmra.mrb[0].mxu1 %vm115_vm0, %v2699_v28  ;;  %v2394_v28 = vpack.c.bf16 %v654_v36, %v653_v35 }
  0x1c   :  { %2389 = vmatpush3.bf16.msra.mxu1 %v2388_v30  ;;  %2234 = vmatprep.mubr.msk.f32.mxu1 %vm2609_vm1, %v2610_v20 }
  0x1d   :  { %2390 = vmatprep.subr.bf16.mxu1 %v2608_v18 }
  0x1e   :  { %2370 = vmatpush3.bf16.msra.mxu0 %v2367_v46  ;;  %v2611_v46 = vmov 0  }
  0x1f   :  { %2372 = vmatprep.subr.bf16.mxu0 %v2371_v51  ;;  %2473 = vset.pattern.permute.xlu0 %v2611_v46 }
  0x20   :  { %2392 = vmatpush3.bf16.msra.mxu1 %v2391_v34  ;;  %2472 = vset.pattern.permute.xlu1 %v2611_v46 }
  0x21   :  { %2202 = vmatmul.mubr.msk.f32.vlgmr.msra.gmra.mrb[0].mxu0 %vm115_vm0, %v102_v54  ;;  %2393 = vmatprep.subr.bf16.mxu1 %v2608_v18 }
  0x22   :  { %2374 = vmatpush3.bf16.msra.mxu0 %v2371_v51  ;;  %2212 = vmatprep.mubr.msk.f32.mxu0 %vm115_vm0, %v105_v55 }
  0x23   :  { %2376 = vmatprep.subr.bf16.mxu0 %v2375_v56  ;;  %2235 = vmatmul.mubr.msk.f32.vlgmr.msra.gmra.mrb[2].mxu1 %vm115_vm0, %v2686_v15 }
  0x24   :  { %2395 = vmatpush3.bf16.msra.mxu1 %v2394_v28  ;;  %2245 = vmatprep.mubr.msk.f32.mxu1 %vm2609_vm1, %v2610_v20 }
  0x25   :  { %2396 = vmatprep.subr.bf16.mxu1 %v2608_v18 }
  0x26   :  { %2378 = vmatpush3.bf16.msra.mxu0 %v2375_v56  ;;  %v652_v56 = vrot.slane %v2752_v59, %v651_v53 }
  0x27   :  { %2405 = vmatprep.subr.bf16.mxu0 %v2608_v18 }
  0x28   :  { %2398 = vmatpush3.bf16.msra.mxu1 %v2397_v39 }
  0x29   :  { %2213 = vmatmul.mubr.msk.f32.vlgmr.msra.gmra.mrb[0].mxu0 %vm115_vm0, %v106_v58  ;;  %2399 = vmatprep.subr.bf16.mxu1 %v2608_v18 }
  0x2a   :  { %2267 = vmatprep.mubr.msk.f32.mxu0 %vm2609_vm1, %v2610_v20  ;;  %2407 = vmatpush3.bf16.msra.mxu0 %v2790_v26 }
  0x2b   :  { %2408 = vmatprep.subr.bf16.mxu0 %v2608_v18  ;;  %2246 = vmatmul.mubr.msk.f32.vlgmr.msra.gmra.mrb[2].mxu1 %vm115_vm0, %v2681_v14  ;;  %v475_v14 = vand.u32 127, %v33_v3 }
  0x2c   :  { %2401 = vmatpush3.bf16.msra.mxu1 %v2790_v26  ;;  %2256 = vmatprep.mubr.msk.f32.mxu1 %vm2609_vm1, %v2610_v20 }
  0x2d   :  { %2402 = vmatprep.subr.bf16.mxu1 %v2608_v18  ;;  %v478_v40 = vsub.s32 %v475_v14, %v2668_v10 }
  0x2e   :  { %2410 = vmatpush3.bf16.msra.mxu0 %v2807_v33 }
  0x2f   :  { %2417 = vmatprep.subr.bf16.mxu0 %v2608_v18 }
  0x30   :  { %2404 = vmatpush3.bf16.msra.mxu1 %v2807_v33 }
  0x31   :  { %2411 = vmatprep.subr.bf16.mxu1 %v2608_v18 }
  0x33   :  { %2257 = vmatmul.mubr.f32.vlgmr.msra.gmra.mrb[4].mxu1 %v2610_v20 }
  0x34   :  { %2413 = vmatpush3.bf16.msra.mxu1 %v2790_v26  ;;  %2278 = vmatprep.mubr.msk.f32.mxu1 %vm2609_vm1, %v2610_v20 }
  0x35   :  { %2414 = vmatprep.subr.bf16.mxu1 %v2608_v18 }
  0x38   :  { %2416 = vmatpush3.bf16.msra.mxu1 %v2807_v33 }
  0x39   :  { %2423 = vmatprep.subr.bf16.mxu1 %v2608_v18 }
  0xee   :  { %v2225_v57 = vpop.f32.mrb[0].mxu1 }
  0xef   :  { %v624_v58 = vpop.f32.mrb[1].mxu1  ;;  %v2871_v16 = vadd.f32 %v2225_v57, %v636_v13 }
  0xf0   :  { %v2873_v21 = vadd.f32 %v636_v13, %v624_v58 }
  0xfc   :  { %v2214_v61 = vpop.f32.mrb[0].mxu0 }
  0xfd   :  { %v457_v62 = vadd.f32 %v2214_v61, %v455_v60  ;;  %v441_v63 = vpop.f32.mrb[1].mxu0 }
  0xfe   :  { %v456_v0 = vadd.f32 %v455_v60, %v441_v63 }
  0xff   :  { %2474 = vtanh.f32 %v457_v62 }
 0x100   :  { %2476 = vtanh.f32 %v456_v0 }
 0x106   :  { %v879_v60 = vpop.f32.mrb[4].mxu1 }
 0x107   :  { %v2258_v61 = vpop.f32.mrb[5].mxu1  ;;  %v884_v17 = vrot.slane %v879_v60, 1  ;;  %v887_v23 = vadd.f32 %v879_v60, %v2873_v21 }
 0x109   :  { %v2475_v4 = vpop.eup %2474  ;;  %v888_v22 = vadd.f32 %v884_v17, %v2871_v16  ;;  %v2062_v25 = vmul.f32 -1.442695, %v887_v23 }
 0x10a   :  { %v2477_v5 = vpop.eup %2476  ;;  %v465_v8 = vmul.f32 %v2475_v4, %v463_v2 }
 0x10b   :  { %v464_v6 = vmul.f32 %v2477_v5, %v463_v2  ;;  %v2063_v24 = vmul.f32 -1.442695, %v888_v22 }
 0x10c   :  { %v469_v9 = vsel %vm115_vm0, %v465_v8, 0.0 }
 0x10d   :  { %v466_v7 = vsel %vm115_vm0, %v464_v6, 0.0 }
 0x10e   :  { %467 = vadd.xlane.f32.xlu0 %v466_v7 }
 0x112   :  { %470 = vadd.xlane.f32.xlu0 %v469_v9  ;;  %v641_v9 = vsub.s32 3, %v2668_v10 }
 0x114   :  { %v642_v11 = vrot.slane %v2752_v59, %v641_v9 }
 0x19b   :  { %v468_v15 = vpop.xlane.xlu0 %467 }
 0x19c   :  { %v479_v42 = vrot.slane %v468_v15, %v478_v40 }
 0x19f   :  { %v471_v41 = vpop.xlane.xlu0 %470 }
 0x1a0   :  { %v483_v43 = vrot.slane %v471_v41, %v478_v40 }
 0x1a2   :  { %v485_v44 = vsel %vm484_vm2, %v483_v43, %v479_v42 }
 0x1a3   :  { %v488_v45 = vsel %vm487_vm3, %v485_v44, -inf }
 0x1a4   :  { %489 = vmax.xlane.f32.xlu1 %v488_v45 }
 0x231   :  { %v490_v47 = vpop.xlane.xlu1 %489 }
 0x232   :  { %v495_v48 = vrot.slane %v490_v47, %v2691_v19  ;;  %v499_v3 = vrot.slane %v490_v47, %v2757_v1 }
 0x234   :  { %v502_v49 = vsub.f32 %v468_v15, %v495_v48  ;;  %v503_v50 = vsub.f32 %v471_v41, %v499_v3 }
 0x236   :  { %v504_v51 = vmul.f32 1.442695, %v502_v49  ;;  %v506_v52 = vmul.f32 1.442695, %v503_v50 }
 0x238   :  { %2478 = vpow2.f32 %v504_v51 }
 0x239   :  { %2480 = vpow2.f32 %v506_v52 }
 0x23a   :  { %2482 = vpow2.f32 %v2063_v24 }
 0x23b   :  { %2484 = vpow2.f32 %v2062_v25 }
 0x242   :  { %v2479_v54 = vpop.eup %2478 }
 0x243   :  { %v2481_v55 = vpop.eup %2480  ;;  %511 = vperm.xlu1 %2472, %v2479_v54  }
 0x244   :  { %514 = vperm.xlu0 %2473, %v2481_v55   ;;  %v2483_v27 = vpop.eup %2482 }
 0x245   :  { %v896_v29 = vadd.f32 1.0, %v2483_v27  ;;  %v2485_v30 = vpop.eup %2484 }
 0x246   :  { %v895_v31 = vadd.f32 1.0, %v2485_v30 }
 0x247   :  { %902 = vrot.lane.b32.xlu1 %v652_v56, %s2612_s2  ;;  %2486 = vrcp.f32 %v896_v29 }
 0x248   :  { %2488 = vrcp.f32 %v895_v31 }
 0x251   :  { %v2487_v59 = vpop.eup %2486 }
 0x252   :  { %v2489_v35 = vpop.eup %2488 }
 0x2c2   :  { %v512_v62 = vpop.permute.xlu1 %511 }
 0x2c3   :  { %v515_v63 = vpop.permute.xlu0 %514  ;;  %v519_v0 = vrot.slane %v512_v62, %v478_v40 }
 0x2c4   :  { %v523_v2 = vrot.slane %v515_v63, %v478_v40 }
 0x2c6   :  { %v2859_v4 = vpop.permute.xlu1 %902  ;;  %v524_v5 = vsel %vm484_vm2, %v523_v2, %v519_v0 }
 0x2c7   :  { %v526_v6 = vsel %vm487_vm3, %v524_v5, 0.0  ;;  %v905_v7 = vadd.f32 %v2859_v4, %v879_v60 }
 0x2c8   :  { %527 = vadd.xlane.f32.xlu1 %v526_v6 }
 0x2c9   :  { %v907_v8 = vrot.slane %v905_v7, 1 }
 0x2cb   :  { %910 = vrot.lane.b32.xlu0 %v907_v8, %s2613_s15 }
 0x2cf   :  { %908 = vrot.lane.b32.xlu0 %v905_v7, %s2613_s15 }
 0x2d3   :  { %644 = vrot.lane.b32.xlu0 %v642_v11, %s2612_s2 }
 0x33d   :  { %v911_v32 = vpop.permute.xlu0 %910 }
 0x33e   :  { %v915_v34 = vmul.f32 %v2487_v59, %v911_v32 }
 0x340   :  { %920 = vrot.lane.b32.xlu1 %v915_v34, %s2612_s2 }
 0x341   :  { %v909_v36 = vpop.permute.xlu0 %908 }
 0x342   :  { %v914_v28 = vmul.f32 %v2489_v35, %v909_v36 }
 0x344   :  { %918 = vrot.lane.b32.xlu0 %v914_v28, %s2612_s2 }
 0x345   :  { %v645_v42 = vpop.permute.xlu0 %644 }
 0x346   :  { %v2881_v44 = vadd.f32 %v2225_v57, %v645_v42  ;;  %v2884_v47 = vadd.f32 %v645_v42, %v624_v58 }
 0x355   :  { %v528_v37 = vpop.xlane.xlu1 %527 }
 0x356   :  { %v537_v38 = vrot.slane %v528_v37, %v2757_v1  ;;  %v533_v39 = vrot.slane %v528_v37, %v2691_v19 }
 0x358   :  { %2490 = vrcp.f32 %v537_v38 }
 0x359   :  { %2492 = vrcp.f32 %v533_v39 }
 0x362   :  { %v2491_v14 = vpop.eup %2490 }
 0x363   :  { %v543_v15 = vmul.f32 %v2491_v14, %v2481_v55  ;;  %v2493_v40 = vpop.eup %2492 }
 0x364   :  { %v541_v41 = vmul.f32 %v2493_v40, %v2479_v54 }
 0x365   :  { %935 = vperm.xlu0 %2473, %v543_v15  }
 0x369   :  { %930 = vperm.xlu0 %2473, %v541_v41  }
 0x3b2   :  { %v921_v43 = vpop.permute.xlu1 %920 }
 0x3b3   :  { %v925_v45 = vadd.f32 %v921_v43, %v2881_v44 }
 0x3b5   :  { %2494 = vtanh.f32 %v925_v45 }
 0x3b6   :  { %v919_v46 = vpop.permute.xlu0 %918 }
 0x3b7   :  { %v924_v19 = vadd.f32 %v919_v46, %v2884_v47 }
 0x3b9   :  { %2496 = vtanh.f32 %v924_v19 }
 0x3bf   :  { %v2495_v3 = vpop.eup %2494 }
 0x3c3   :  { %v2497_v54 = vpop.eup %2496 }
 0x3e4   :  { %v2887_v1 = vpop.permute.xlu0 %935 }
 0x3e5   :  { %v2890_v48 = vsub.f32 1.0, %v2887_v1  ;;  %v939_v49 = vmul.f32 %v2495_v3, %v2887_v1 }
 0x3e7   :  { %v943_v50 = vmul.f32 0.0, %v2890_v48 }
 0x3e8   :  { %v2894_v51 = vpop.permute.xlu0 %930 }
 0x3e9   :  { %v2897_v52 = vsub.f32 1.0, %v2894_v51  ;;  %v945_v53 = vadd.f32 %v943_v50, %v939_v49  ;;  %v938_v55 = vmul.f32 %v2497_v54, %v2894_v51 }
 0x3eb   :  { %v942_v56 = vmul.f32 0.0, %v2897_v52  ;;  %v948_v58 = vrot.slane %v945_v53, 7 }
 0x3ed   :  { %v944_v57 = vadd.f32 %v942_v56, %v938_v55 }
 0x3ef   :  { %v949_v60 = vsel %vm484_vm2, %v948_v58, %v944_v57  ;;  %v1067_v5 = vrot.slane %v944_v57, 7 }
 0x3f0   :  { %950 = vrot.lane.b32.xlu0 %v949_v60, %s2613_s15 }
 0x462   :  { %v951_v61 = vpop.permute.xlu0 %950 }
 0x463   :  { %2268 = vmatmul.mubr.msk.f32.vlgmr.msra.gmra.mrb[2].mxu0 %vm115_vm0, %v951_v61 }
 0x464   :  { %2419 = vmatpush3.bf16.msra.mxu0 %v2790_v26  ;;  %2289 = vmatprep.mubr.msk.f32.mxu0 %vm2609_vm1, %v2610_v20 }
 0x465   :  { %2420 = vmatprep.subr.bf16.mxu0 %v2608_v18 }
 0x468   :  { %2422 = vmatpush3.bf16.msra.mxu0 %v2807_v33 }
 0x469   :  { %2429 = vmatprep.subr.bf16.mxu0 %v2608_v18 }
 0x536   :  { %v1020_v62 = vpop.f32.mrb[2].mxu0 }
 0x537   :  { %v1042_v63 = vadd.f32 %v1020_v62, %v2859_v4  ;;  %v2269_v0 = vpop.f32.mrb[3].mxu0  ;;  %v1025_v6 = vrot.slane %v1020_v62, 7  ;;  %v1029_v7 = vadd.f32 %v1020_v62, %v2871_v16 }
 0x539   :  { %1047 = vrot.lane.b32.xlu0 %v1042_v63, %s2613_s15  ;;  %v1044_v2 = vrot.slane %v1042_v63, 7  ;;  %v1028_v8 = vadd.f32 %v1025_v6, %v2873_v21  ;;  %v2066_v9 = vmul.f32 -1.442695, %v1029_v7 }
 0x53b   :  { %1045 = vrot.lane.b32.xlu1 %v1044_v2, %s2613_s15  ;;  %v2065_v11 = vmul.f32 -1.442695, %v1028_v8  ;;  %2498 = vpow2.f32 %v2066_v9 }
 0x53d   :  { %1070 = vrot.lane.b32.xlu0 %v948_v58, %s2613_s15  ;;  %2500 = vpow2.f32 %v2065_v11 }
 0x53f   :  { %1068 = vrot.lane.b32.xlu1 %v1067_v5, %s2613_s15 }
 0x545   :  { %v2499_v12 = vpop.eup %2498 }
 0x546   :  { %v1037_v17 = vadd.f32 1.0, %v2499_v12 }
 0x547   :  { %v2501_v13 = vpop.eup %2500 }
 0x548   :  { %v1036_v22 = vadd.f32 1.0, %v2501_v13  ;;  %2502 = vrcp.f32 %v1037_v17 }
 0x54a   :  { %2504 = vrcp.f32 %v1036_v22 }
 0x552   :  { %v2503_v23 = vpop.eup %2502 }
 0x554   :  { %v2505_v27 = vpop.eup %2504 }
 0x5ab   :  { %v1048_v24 = vpop.permute.xlu0 %1047 }
 0x5ac   :  { %v1052_v25 = vmul.f32 %v2503_v23, %v1048_v24 }
 0x5ad   :  { %v1046_v29 = vpop.permute.xlu1 %1045 }
 0x5ae   :  { %v1051_v30 = vmul.f32 %v2505_v27, %v1046_v29  ;;  %1057 = vrot.lane.b32.xlu0 %v1052_v25, %s2612_s2 }
 0x5af   :  { %v1071_v31 = vpop.permute.xlu0 %1070 }
 0x5b0   :  { %v1075_v59 = vmul.f32 %v1071_v31, %v2890_v48  ;;  %1055 = vrot.lane.b32.xlu1 %v1051_v30, %s2612_s2 }
 0x5b1   :  { %v1069_v32 = vpop.permute.xlu1 %1068 }
 0x5b2   :  { %v1074_v34 = vmul.f32 %v1069_v32, %v2897_v52  ;;  %1080 = vrot.lane.b32.xlu0 %v1075_v59, %s2612_s2 }
 0x5b4   :  { %1078 = vrot.lane.b32.xlu1 %v1074_v34, %s2612_s2 }
 0x620   :  { %v1058_v35 = vpop.permute.xlu0 %1057 }
 0x621   :  { %v1062_v36 = vadd.f32 %v1058_v35, %v2881_v44 }
 0x622   :  { %v1056_v28 = vpop.permute.xlu1 %1055 }
 0x623   :  { %2506 = vtanh.f32 %v1062_v36  ;;  %v1061_v37 = vadd.f32 %v1056_v28, %v2884_v47 }
 0x624   :  { %v1081_v42 = vpop.permute.xlu0 %1080 }
 0x625   :  { %2508 = vtanh.f32 %v1061_v37 }
 0x626   :  { %v1079_v40 = vpop.permute.xlu1 %1078 }
 0x62d   :  { %v2507_v38 = vpop.eup %2506 }
 0x62e   :  { %v1066_v14 = vmul.f32 %v2507_v38, %v2887_v1 }
 0x62f   :  { %v2509_v39 = vpop.eup %2508 }
 0x630   :  { %v1065_v15 = vmul.f32 %v2509_v39, %v2894_v51  ;;  %v1085_v43 = vadd.f32 %v1081_v42, %v1066_v14 }
 0x632   :  { %v1084_v41 = vadd.f32 %v1079_v40, %v1065_v15  ;;  %v1210_v55 = vrot.slane %v1085_v43, 7 }
 0x634   :  { %v1088_v45 = vrot.slane %v1084_v41, 1  ;;  %v1209_v56 = vrot.slane %v1084_v41, 7 }
 0x636   :  { %v1089_v46 = vsel %vm484_vm2, %v1085_v43, %v1088_v45 }
 0x637   :  { %1090 = vrot.lane.b32.xlu1 %v1089_v46, %s2613_s15 }
 0x6a9   :  { %v1091_v19 = vpop.permute.xlu1 %1090 }
 0x6aa   :  { %2279 = vmatmul.mubr.msk.f32.vlgmr.msra.gmra.mrb[6].mxu1 %vm115_vm0, %v1091_v19 }
 0x6ab   :  { %2425 = vmatpush3.bf16.msra.mxu1 %v2790_v26  ;;  %2300 = vmatprep.mubr.msk.f32.mxu1 %vm2609_vm1, %v2610_v20 }
 0x6ac   :  { %2426 = vmatprep.subr.bf16.mxu1 %v2608_v18 }
 0x6af   :  { %2428 = vmatpush3.bf16.msra.mxu1 %v2807_v33 }
 0x6b0   :  { %2435 = vmatprep.subr.bf16.mxu1 %v2608_v18 }
 0x77d   :  { %v1160_v3 = vpop.f32.mrb[6].mxu1 }
 0x77e   :  { %v1183_v49 = vadd.f32 %v1160_v3, %v2859_v4  ;;  %v2280_v50 = vpop.f32.mrb[7].mxu1  ;;  %v1165_v57 = vrot.slane %v1160_v3, 6  ;;  %v1166_v58 = vrot.slane %v1160_v3, 7 }
 0x780   :  { %v1186_v53 = vrot.slane %v1183_v49, 7  ;;  %v1185_v54 = vrot.slane %v1183_v49, 6  ;;  %v1169_v60 = vadd.f32 %v1165_v57, %v2873_v21  ;;  %v1170_v61 = vadd.f32 %v1166_v58, %v2871_v16 }
 0x782   :  { %1189 = vrot.lane.b32.xlu1 %v1186_v53, %s2613_s15  ;;  %1187 = vrot.lane.b32.xlu0 %v1185_v54, %s2613_s15  ;;  %v2068_v62 = vmul.f32 -1.442695, %v1169_v60  ;;  %v2069_v63 = vmul.f32 -1.442695, %v1170_v61 }
 0x784   :  { %2510 = vpow2.f32 %v2068_v62 }
 0x785   :  { %2512 = vpow2.f32 %v2069_v63 }
 0x786   :  { %1213 = vrot.lane.b32.xlu1 %v1210_v55, %s2613_s15  ;;  %1211 = vrot.lane.b32.xlu0 %v1209_v56, %s2613_s15 }
 0x78e   :  { %v2511_v0 = vpop.eup %2510 }
 0x78f   :  { %v2513_v2 = vpop.eup %2512  ;;  %v1177_v5 = vadd.f32 1.0, %v2511_v0 }
 0x790   :  { %v1178_v6 = vadd.f32 1.0, %v2513_v2 }
 0x791   :  { %2514 = vrcp.f32 %v1177_v5 }
 0x792   :  { %2516 = vrcp.f32 %v1178_v6 }
 0x79b   :  { %v2515_v7 = vpop.eup %2514 }
 0x79c   :  { %v2517_v8 = vpop.eup %2516 }
 0x7f4   :  { %v1190_v9 = vpop.permute.xlu1 %1189  ;;  %v1188_v11 = vpop.permute.xlu0 %1187 }
 0x7f5   :  { %v1194_v12 = vmul.f32 %v2517_v8, %v1190_v9  ;;  %v1193_v13 = vmul.f32 %v2515_v7, %v1188_v11 }
 0x7f7   :  { %1199 = vrot.lane.b32.xlu1 %v1194_v12, %s2612_s2  ;;  %1197 = vrot.lane.b32.xlu0 %v1193_v13, %s2612_s2 }
 0x7f8   :  { %v1214_v17 = vpop.permute.xlu1 %1213  ;;  %v1212_v22 = vpop.permute.xlu0 %1211 }
 0x7f9   :  { %v1218_v23 = vmul.f32 %v1214_v17, %v2890_v48  ;;  %v1217_v24 = vmul.f32 %v1212_v22, %v2897_v52 }
 0x7fb   :  { %1223 = vrot.lane.b32.xlu1 %v1218_v23, %s2612_s2  ;;  %1221 = vrot.lane.b32.xlu0 %v1217_v24, %s2612_s2 }
 0x869   :  { %v1200_v25 = vpop.permute.xlu1 %1199  ;;  %v1198_v27 = vpop.permute.xlu0 %1197 }
 0x86a   :  { %v1204_v29 = vadd.f32 %v1200_v25, %v2881_v44  ;;  %v1203_v30 = vadd.f32 %v1198_v27, %v2884_v47 }
 0x86c   :  { %2518 = vtanh.f32 %v1204_v29 }
 0x86d   :  { %2520 = vtanh.f32 %v1203_v30  ;;  %v1224_v34 = vpop.permute.xlu1 %1223  ;;  %v1222_v28 = vpop.permute.xlu0 %1221 }
 0x876   :  { %v2519_v31 = vpop.eup %2518 }
 0x877   :  { %v2521_v59 = vpop.eup %2520  ;;  %v1208_v32 = vmul.f32 %v2519_v31, %v2887_v1 }
 0x878   :  { %v1207_v35 = vmul.f32 %v2521_v59, %v2894_v51 }
 0x879   :  { %v1228_v36 = vadd.f32 %v1224_v34, %v1208_v32 }
 0x87a   :  { %v1227_v37 = vadd.f32 %v1222_v28, %v1207_v35 }
 0x87b   :  { %v1232_v38 = vrot.slane %v1228_v36, 1  ;;  %v1354_v46 = vrot.slane %v1228_v36, 7 }
 0x87c   :  { %v1231_v39 = vrot.slane %v1227_v37, 2  ;;  %v1353_v19 = vrot.slane %v1227_v37, 7 }
 0x87e   :  { %v1233_v14 = vsel %vm484_vm2, %v1232_v38, %v1231_v39 }
 0x87f   :  { %1234 = vrot.lane.b32.xlu0 %v1233_v14, %s2613_s15 }
 0x8f1   :  { %v1235_v15 = vpop.permute.xlu0 %1234 }
 0x8f2   :  { %2290 = vmatmul.mubr.msk.f32.vlgmr.msra.gmra.mrb[4].mxu0 %vm115_vm0, %v1235_v15 }
 0x8f3   :  { %2431 = vmatpush3.bf16.msra.mxu0 %v2790_v26  ;;  %2311 = vmatprep.mubr.msk.f32.mxu0 %vm2609_vm1, %v2610_v20 }
 0x8f4   :  { %2432 = vmatprep.subr.bf16.mxu0 %v2608_v18 }
 0x8f7   :  { %2434 = vmatpush3.bf16.msra.mxu0 %v2807_v33 }
 0x8f8   :  { %2441 = vmatprep.subr.bf16.mxu0 %v2608_v18 }
 0x9c5   :  { %v1304_v40 = vpop.f32.mrb[4].mxu0 }
 0x9c6   :  { %v1327_v41 = vadd.f32 %v1304_v40, %v2859_v4  ;;  %v2291_v42 = vpop.f32.mrb[5].mxu0  ;;  %v1309_v3 = vrot.slane %v1304_v40, 5  ;;  %v1310_v49 = vrot.slane %v1304_v40, 6 }
 0x9c8   :  { %v1330_v43 = vrot.slane %v1327_v41, 6  ;;  %v1329_v45 = vrot.slane %v1327_v41, 5  ;;  %v1313_v50 = vadd.f32 %v1309_v3, %v2873_v21  ;;  %v1314_v53 = vadd.f32 %v1310_v49, %v2871_v16 }
 0x9ca   :  { %1333 = vrot.lane.b32.xlu0 %v1330_v43, %s2613_s15  ;;  %1331 = vrot.lane.b32.xlu1 %v1329_v45, %s2613_s15  ;;  %v2071_v54 = vmul.f32 -1.442695, %v1313_v50  ;;  %v2072_v55 = vmul.f32 -1.442695, %v1314_v53 }
 0x9cc   :  { %2522 = vpow2.f32 %v2071_v54 }
 0x9cd   :  { %2524 = vpow2.f32 %v2072_v55 }
 0x9ce   :  { %1357 = vrot.lane.b32.xlu0 %v1354_v46, %s2613_s15  ;;  %1355 = vrot.lane.b32.xlu1 %v1353_v19, %s2613_s15 }
 0x9d6   :  { %v2523_v56 = vpop.eup %2522 }
 0x9d7   :  { %v2525_v57 = vpop.eup %2524  ;;  %v1321_v58 = vadd.f32 1.0, %v2523_v56 }
 0x9d8   :  { %v1322_v60 = vadd.f32 1.0, %v2525_v57 }
 0x9d9   :  { %2526 = vrcp.f32 %v1321_v58 }
 0x9da   :  { %2528 = vrcp.f32 %v1322_v60 }
 0x9e3   :  { %v2527_v61 = vpop.eup %2526 }
 0x9e4   :  { %v2529_v62 = vpop.eup %2528 }
 0xa3c   :  { %v1334_v63 = vpop.permute.xlu0 %1333  ;;  %v1332_v0 = vpop.permute.xlu1 %1331 }
 0xa3d   :  { %v1338_v2 = vmul.f32 %v2529_v62, %v1334_v63  ;;  %v1337_v5 = vmul.f32 %v2527_v61, %v1332_v0 }
 0xa3f   :  { %1343 = vrot.lane.b32.xlu0 %v1338_v2, %s2612_s2  ;;  %1341 = vrot.lane.b32.xlu1 %v1337_v5, %s2612_s2 }
 0xa40   :  { %v1358_v6 = vpop.permute.xlu0 %1357  ;;  %v1356_v7 = vpop.permute.xlu1 %1355 }
 0xa41   :  { %v1362_v8 = vmul.f32 %v1358_v6, %v2890_v48  ;;  %v1361_v9 = vmul.f32 %v1356_v7, %v2897_v52 }
 0xa43   :  { %1367 = vrot.lane.b32.xlu0 %v1362_v8, %s2612_s2  ;;  %1365 = vrot.lane.b32.xlu1 %v1361_v9, %s2612_s2 }
 0xab1   :  { %v1344_v11 = vpop.permute.xlu0 %1343  ;;  %v1342_v12 = vpop.permute.xlu1 %1341 }
 0xab2   :  { %v1348_v13 = vadd.f32 %v1344_v11, %v2881_v44  ;;  %v1347_v17 = vadd.f32 %v1342_v12, %v2884_v47 }
 0xab4   :  { %2530 = vtanh.f32 %v1348_v13 }
 0xab5   :  { %2532 = vtanh.f32 %v1347_v17  ;;  %v1368_v25 = vpop.permute.xlu0 %1367  ;;  %v1366_v30 = vpop.permute.xlu1 %1365 }
 0xabe   :  { %v2531_v22 = vpop.eup %2530 }
 0xabf   :  { %v2533_v23 = vpop.eup %2532  ;;  %v1352_v24 = vmul.f32 %v2531_v22, %v2887_v1 }
 0xac0   :  { %v1351_v27 = vmul.f32 %v2533_v23, %v2894_v51 }
 0xac1   :  { %v1372_v29 = vadd.f32 %v1368_v25, %v1352_v24 }
 0xac2   :  { %v1371_v31 = vadd.f32 %v1366_v30, %v1351_v27 }
 0xac3   :  { %v1376_v59 = vrot.slane %v1372_v29, 2  ;;  %v1498_v14 = vrot.slane %v1372_v29, 7 }
 0xac4   :  { %v1375_v32 = vrot.slane %v1371_v31, 3  ;;  %v1497_v15 = vrot.slane %v1371_v31, 7 }
 0xac6   :  { %v1377_v34 = vsel %vm484_vm2, %v1376_v59, %v1375_v32 }
 0xac7   :  { %1378 = vrot.lane.b32.xlu1 %v1377_v34, %s2613_s15 }
 0xb39   :  { %v1379_v35 = vpop.permute.xlu1 %1378 }
 0xb3a   :  { %2301 = vmatmul.mubr.msk.f32.vlgmr.msra.gmra.mrb[8].mxu1 %vm115_vm0, %v1379_v35 }
 0xb3b   :  { %2437 = vmatpush3.bf16.msra.mxu1 %v2790_v26  ;;  %2322 = vmatprep.mubr.msk.f32.mxu1 %vm2609_vm1, %v2610_v20 }
 0xb3c   :  { %2438 = vmatprep.subr.bf16.mxu1 %v2608_v18 }
 0xb3f   :  { %2440 = vmatpush3.bf16.msra.mxu1 %v2807_v33 }
 0xb40   :  { %2447 = vmatprep.subr.bf16.mxu1 %v2608_v18 }
 0xc0d   :  { %v1448_v36 = vpop.f32.mrb[8].mxu1 }
 0xc0e   :  { %v1471_v28 = vadd.f32 %v1448_v36, %v2859_v4  ;;  %v2302_v37 = vpop.f32.mrb[9].mxu1  ;;  %v1453_v40 = vrot.slane %v1448_v36, 4  ;;  %v1454_v41 = vrot.slane %v1448_v36, 5 }
 0xc10   :  { %v1474_v38 = vrot.slane %v1471_v28, 5  ;;  %v1473_v39 = vrot.slane %v1471_v28, 4  ;;  %v1457_v42 = vadd.f32 %v1453_v40, %v2873_v21  ;;  %v1458_v43 = vadd.f32 %v1454_v41, %v2871_v16 }
 0xc12   :  { %1477 = vrot.lane.b32.xlu1 %v1474_v38, %s2613_s15  ;;  %1475 = vrot.lane.b32.xlu0 %v1473_v39, %s2613_s15  ;;  %v2074_v45 = vmul.f32 -1.442695, %v1457_v42  ;;  %v2075_v46 = vmul.f32 -1.442695, %v1458_v43 }
 0xc14   :  { %2534 = vpow2.f32 %v2074_v45 }
 0xc15   :  { %2536 = vpow2.f32 %v2075_v46 }
 0xc16   :  { %1501 = vrot.lane.b32.xlu1 %v1498_v14, %s2613_s15  ;;  %1499 = vrot.lane.b32.xlu0 %v1497_v15, %s2613_s15 }
 0xc1e   :  { %v2535_v19 = vpop.eup %2534 }
 0xc1f   :  { %v2537_v3 = vpop.eup %2536  ;;  %v1465_v49 = vadd.f32 1.0, %v2535_v19 }
 0xc20   :  { %v1466_v50 = vadd.f32 1.0, %v2537_v3 }
 0xc21   :  { %2538 = vrcp.f32 %v1465_v49 }
 0xc22   :  { %2540 = vrcp.f32 %v1466_v50 }
 0xc2b   :  { %v2539_v53 = vpop.eup %2538 }
 0xc2c   :  { %v2541_v54 = vpop.eup %2540 }
 0xc84   :  { %v1478_v55 = vpop.permute.xlu1 %1477  ;;  %v1476_v56 = vpop.permute.xlu0 %1475 }
 0xc85   :  { %v1482_v57 = vmul.f32 %v2541_v54, %v1478_v55  ;;  %v1481_v58 = vmul.f32 %v2539_v53, %v1476_v56 }
 0xc87   :  { %1487 = vrot.lane.b32.xlu1 %v1482_v57, %s2612_s2  ;;  %1485 = vrot.lane.b32.xlu0 %v1481_v58, %s2612_s2 }
 0xc88   :  { %v1502_v60 = vpop.permute.xlu1 %1501  ;;  %v1500_v61 = vpop.permute.xlu0 %1499 }
 0xc89   :  { %v1506_v62 = vmul.f32 %v1502_v60, %v2890_v48  ;;  %v1505_v63 = vmul.f32 %v1500_v61, %v2897_v52 }
 0xc8b   :  { %1511 = vrot.lane.b32.xlu1 %v1506_v62, %s2612_s2  ;;  %1509 = vrot.lane.b32.xlu0 %v1505_v63, %s2612_s2 }
 0xcf9   :  { %v1488_v0 = vpop.permute.xlu1 %1487  ;;  %v1486_v2 = vpop.permute.xlu0 %1485 }
 0xcfa   :  { %v1492_v5 = vadd.f32 %v1488_v0, %v2881_v44  ;;  %v1491_v6 = vadd.f32 %v1486_v2, %v2884_v47 }
 0xcfc   :  { %2542 = vtanh.f32 %v1492_v5 }
 0xcfd   :  { %2544 = vtanh.f32 %v1491_v6  ;;  %v1512_v11 = vpop.permute.xlu1 %1511  ;;  %v1510_v17 = vpop.permute.xlu0 %1509 }
 0xd06   :  { %v2543_v7 = vpop.eup %2542 }
 0xd07   :  { %v2545_v8 = vpop.eup %2544  ;;  %v1496_v9 = vmul.f32 %v2543_v7, %v2887_v1 }
 0xd08   :  { %v1495_v12 = vmul.f32 %v2545_v8, %v2894_v51 }
 0xd09   :  { %v1516_v13 = vadd.f32 %v1512_v11, %v1496_v9 }
 0xd0a   :  { %v1515_v22 = vadd.f32 %v1510_v17, %v1495_v12 }
 0xd0b   :  { %v1520_v23 = vrot.slane %v1516_v13, 3  ;;  %v1642_v34 = vrot.slane %v1516_v13, 7 }
 0xd0c   :  { %v1519_v24 = vrot.slane %v1515_v22, 4  ;;  %v1641_v35 = vrot.slane %v1515_v22, 7 }
 0xd0e   :  { %v1521_v25 = vsel %vm484_vm2, %v1520_v23, %v1519_v24 }
 0xd0f   :  { %1522 = vrot.lane.b32.xlu0 %v1521_v25, %s2613_s15 }
 0xd81   :  { %v1523_v27 = vpop.permute.xlu0 %1522 }
 0xd82   :  { %2312 = vmatmul.mubr.msk.f32.vlgmr.msra.gmra.mrb[6].mxu0 %vm115_vm0, %v1523_v27 }
 0xd83   :  { %2443 = vmatpush3.bf16.msra.mxu0 %v2790_v26  ;;  %2333 = vmatprep.mubr.msk.f32.mxu0 %vm2609_vm1, %v2610_v20 }
 0xd84   :  { %2444 = vmatprep.subr.bf16.mxu0 %v2608_v18 }
 0xd87   :  { %2446 = vmatpush3.bf16.msra.mxu0 %v2807_v33 }
 0xe55   :  { %v1592_v29 = vpop.f32.mrb[6].mxu0 }
 0xe56   :  { %v1615_v30 = vadd.f32 %v1592_v29, %v2859_v4  ;;  %v2313_v31 = vpop.f32.mrb[7].mxu0  ;;  %v1597_v26 = vrot.slane %v1592_v29, 3  ;;  %v1598_v36 = vrot.slane %v1592_v29, 4 }
 0xe58   :  { %v1618_v59 = vrot.slane %v1615_v30, 4  ;;  %v1617_v32 = vrot.slane %v1615_v30, 3  ;;  %v1601_v33 = vadd.f32 %v1597_v26, %v2873_v21  ;;  %v1602_v28 = vadd.f32 %v1598_v36, %v2871_v16 }
 0xe5a   :  { %1621 = vrot.lane.b32.xlu0 %v1618_v59, %s2613_s15  ;;  %1619 = vrot.lane.b32.xlu1 %v1617_v32, %s2613_s15  ;;  %v2077_v37 = vmul.f32 -1.442695, %v1601_v33  ;;  %v2078_v38 = vmul.f32 -1.442695, %v1602_v28 }
 0xe5c   :  { %2546 = vpow2.f32 %v2077_v37 }
 0xe5d   :  { %2548 = vpow2.f32 %v2078_v38 }
 0xe5e   :  { %1645 = vrot.lane.b32.xlu0 %v1642_v34, %s2613_s15  ;;  %1643 = vrot.lane.b32.xlu1 %v1641_v35, %s2613_s15 }
 0xe66   :  { %v2547_v39 = vpop.eup %2546 }
 0xe67   :  { %v2549_v14 = vpop.eup %2548  ;;  %v1609_v15 = vadd.f32 1.0, %v2547_v39 }
 0xe68   :  { %v1610_v40 = vadd.f32 1.0, %v2549_v14 }
 0xe69   :  { %2550 = vrcp.f32 %v1609_v15 }
 0xe6a   :  { %2552 = vrcp.f32 %v1610_v40 }
 0xe73   :  { %v2551_v41 = vpop.eup %2550 }
 0xe74   :  { %v2553_v42 = vpop.eup %2552 }
 0xecc   :  { %v1622_v43 = vpop.permute.xlu0 %1621  ;;  %v1620_v45 = vpop.permute.xlu1 %1619 }
 0xecd   :  { %v1626_v46 = vmul.f32 %v2553_v42, %v1622_v43  ;;  %v1625_v19 = vmul.f32 %v2551_v41, %v1620_v45 }
 0xecf   :  { %1631 = vrot.lane.b32.xlu0 %v1626_v46, %s2612_s2  ;;  %1629 = vrot.lane.b32.xlu1 %v1625_v19, %s2612_s2 }
 0xed0   :  { %v1646_v3 = vpop.permute.xlu0 %1645  ;;  %v1644_v49 = vpop.permute.xlu1 %1643 }
 0xed1   :  { %v1650_v50 = vmul.f32 %v1646_v3, %v2890_v48  ;;  %v1649_v53 = vmul.f32 %v1644_v49, %v2897_v52 }
 0xed3   :  { %1655 = vrot.lane.b32.xlu0 %v1650_v50, %s2612_s2  ;;  %1653 = vrot.lane.b32.xlu1 %v1649_v53, %s2612_s2 }
 0xf41   :  { %v1632_v54 = vpop.permute.xlu0 %1631  ;;  %v1630_v55 = vpop.permute.xlu1 %1629 }
 0xf42   :  { %v1636_v56 = vadd.f32 %v1632_v54, %v2881_v44  ;;  %v1635_v57 = vadd.f32 %v1630_v55, %v2884_v47 }
 0xf44   :  { %2554 = vtanh.f32 %v1636_v56 }
 0xf45   :  { %2556 = vtanh.f32 %v1635_v57  ;;  %v1656_v62 = vpop.permute.xlu0 %1655  ;;  %v1654_v2 = vpop.permute.xlu1 %1653 }
 0xf4e   :  { %v2555_v58 = vpop.eup %2554 }
 0xf4f   :  { %v2557_v60 = vpop.eup %2556  ;;  %v1640_v61 = vmul.f32 %v2555_v58, %v2887_v1 }
 0xf50   :  { %v1639_v63 = vmul.f32 %v2557_v60, %v2894_v51 }
 0xf51   :  { %v1660_v0 = vadd.f32 %v1656_v62, %v1640_v61 }
 0xf52   :  { %v1659_v5 = vadd.f32 %v1654_v2, %v1639_v63 }
 0xf53   :  { %v1664_v6 = vrot.slane %v1660_v0, 4  ;;  %v1786_v23 = vrot.slane %v1660_v0, 7 }
 0xf54   :  { %v1663_v7 = vrot.slane %v1659_v5, 5  ;;  %v1785_v24 = vrot.slane %v1659_v5, 7 }
 0xf56   :  { %v1665_v8 = vsel %vm484_vm2, %v1664_v6, %v1663_v7 }
 0xf57   :  { %1666 = vrot.lane.b32.xlu1 %v1665_v8, %s2613_s15 }
 0xfc9   :  { %v1667_v9 = vpop.permute.xlu1 %1666 }
 0xfca   :  { %2323 = vmatmul.mubr.msk.f32.vlgmr.msra.gmra.mrb[10].mxu1 %vm115_vm0, %v1667_v9 }
 0xfcb   :  { %2344 = vmatprep.mubr.msk.f32.mxu1 %vm2609_vm1, %v2610_v20 }
0x109d   :  { %v1736_v11 = vpop.f32.mrb[10].mxu1 }
0x109e   :  { %v1759_v12 = vadd.f32 %v1736_v11, %v2859_v4  ;;  %v2324_v13 = vpop.f32.mrb[11].mxu1  ;;  %v1741_v25 = vrot.slane %v1736_v11, 2  ;;  %v1742_v27 = vrot.slane %v1736_v11, 3 }
0x10a0   :  { %v1762_v17 = vrot.slane %v1759_v12, 3  ;;  %v1761_v22 = vrot.slane %v1759_v12, 2  ;;  %v1745_v20 = vadd.f32 %v1741_v25, %v2873_v21  ;;  %v1746_v29 = vadd.f32 %v1742_v27, %v2871_v16 }
0x10a2   :  { %1765 = vrot.lane.b32.xlu1 %v1762_v17, %s2613_s15  ;;  %1763 = vrot.lane.b32.xlu0 %v1761_v22, %s2613_s15  ;;  %v2080_v30 = vmul.f32 -1.442695, %v1745_v20  ;;  %v2081_v31 = vmul.f32 -1.442695, %v1746_v29 }
0x10a4   :  { %2558 = vpow2.f32 %v2080_v30 }
0x10a5   :  { %2560 = vpow2.f32 %v2081_v31 }
0x10a6   :  { %1789 = vrot.lane.b32.xlu1 %v1786_v23, %s2613_s15  ;;  %1787 = vrot.lane.b32.xlu0 %v1785_v24, %s2613_s15 }
0x10ae   :  { %v2559_v59 = vpop.eup %2558 }
0x10af   :  { %v2561_v32 = vpop.eup %2560  ;;  %v1753_v34 = vadd.f32 1.0, %v2559_v59 }
0x10b0   :  { %v1754_v35 = vadd.f32 1.0, %v2561_v32  ;;  %v1949_v32 = vld [vmem:[%s3107_s3 + $0xa0] sm:$0xff] }
0x10b1   :  { %2562 = vrcp.f32 %v1753_v34  ;;  %v1950_v34 = vld [vmem:[%s3107_s3 + $0xa8] sm:$0xff] }
0x10b2   :  { %2564 = vrcp.f32 %v1754_v35  ;;  %v1951_v35 = vld [vmem:[%s3107_s3 + $0xb0] sm:$0xff] }
0x10bb   :  { %v2563_v26 = vpop.eup %2562 }
0x10bc   :  { %v2565_v36 = vpop.eup %2564 }
0x1114   :  { %v1766_v33 = vpop.permute.xlu1 %1765  ;;  %v1764_v28 = vpop.permute.xlu0 %1763 }
0x1115   :  { %v1770_v37 = vmul.f32 %v2565_v36, %v1766_v33  ;;  %v1769_v38 = vmul.f32 %v2563_v26, %v1764_v28  ;;  %v2448_v26 = vpack.c.bf16 %v1950_v34, %v1949_v32 }
0x1117   :  { %1775 = vrot.lane.b32.xlu1 %v1770_v37, %s2612_s2  ;;  %1773 = vrot.lane.b32.xlu0 %v1769_v38, %s2612_s2 }
0x1118   :  { %v1790_v39 = vpop.permute.xlu1 %1789  ;;  %v1788_v14 = vpop.permute.xlu0 %1787  ;;  %2449 = vmatpush3.bf16.msra.mxu1 %v2448_v26 }
0x1119   :  { %v1794_v15 = vmul.f32 %v1790_v39, %v2890_v48  ;;  %v1793_v40 = vmul.f32 %v1788_v14, %v2897_v52  ;;  %2450 = vmatprep.subr.bf16.mxu1 %v2608_v18 }
0x111b   :  { %1799 = vrot.lane.b32.xlu1 %v1794_v15, %s2612_s2  ;;  %1797 = vrot.lane.b32.xlu0 %v1793_v40, %s2612_s2 }
0x1189   :  { %v1776_v41 = vpop.permute.xlu1 %1775  ;;  %v1774_v42 = vpop.permute.xlu0 %1773 }
0x118a   :  { %v1780_v43 = vadd.f32 %v1776_v41, %v2881_v44  ;;  %v1779_v45 = vadd.f32 %v1774_v42, %v2884_v47 }
0x118c   :  { %2566 = vtanh.f32 %v1780_v43 }
0x118d   :  { %2568 = vtanh.f32 %v1779_v45  ;;  %v1800_v49 = vpop.permute.xlu1 %1799  ;;  %v1798_v54 = vpop.permute.xlu0 %1797 }
0x1196   :  { %v2567_v46 = vpop.eup %2566 }
0x1197   :  { %v2569_v19 = vpop.eup %2568  ;;  %v1784_v3 = vmul.f32 %v2567_v46, %v2887_v1 }
0x1198   :  { %v1783_v50 = vmul.f32 %v2569_v19, %v2894_v51 }
0x1199   :  { %v1804_v53 = vadd.f32 %v1800_v49, %v1784_v3 }
0x119a   :  { %v1803_v55 = vadd.f32 %v1798_v54, %v1783_v50 }
0x119b   :  { %v1808_v56 = vrot.slane %v1804_v53, 5  ;;  %v1930_v5 = vrot.slane %v1804_v53, 7 }
0x119c   :  { %v1807_v57 = vrot.slane %v1803_v55, 6  ;;  %v1929_v6 = vrot.slane %v1803_v55, 7 }
0x119e   :  { %v1809_v58 = vsel %vm484_vm2, %v1808_v56, %v1807_v57 }
0x119f   :  { %1810 = vrot.lane.b32.xlu0 %v1809_v58, %s2613_s15 }
0x1211   :  { %v1811_v60 = vpop.permute.xlu0 %1810 }
0x1212   :  { %2334 = vmatmul.mubr.msk.f32.vlgmr.msra.gmra.mrb[8].mxu0 %vm115_vm0, %v1811_v60 }
0x12e5   :  { %v1880_v61 = vpop.f32.mrb[8].mxu0 }
0x12e6   :  { %v1903_v62 = vadd.f32 %v1880_v61, %v2859_v4  ;;  %v2335_v63 = vpop.f32.mrb[9].mxu0  ;;  %v1885_v7 = vrot.slane %v1880_v61, 1  ;;  %v1886_v8 = vrot.slane %v1880_v61, 2 }
0x12e8   :  { %v1906_v0 = vrot.slane %v1903_v62, 2  ;;  %v1905_v2 = vrot.slane %v1903_v62, 1  ;;  %v1889_v9 = vadd.f32 %v1885_v7, %v2873_v21  ;;  %v1890_v11 = vadd.f32 %v1886_v8, %v2871_v16 }
0x12ea   :  { %1909 = vrot.lane.b32.xlu0 %v1906_v0, %s2613_s15  ;;  %1907 = vrot.lane.b32.xlu1 %v1905_v2, %s2613_s15  ;;  %v2083_v4 = vmul.f32 -1.442695, %v1889_v9  ;;  %v2084_v12 = vmul.f32 -1.442695, %v1890_v11 }
0x12ec   :  { %2570 = vpow2.f32 %v2083_v4 }
0x12ed   :  { %2572 = vpow2.f32 %v2084_v12 }
0x12ee   :  { %1933 = vrot.lane.b32.xlu0 %v1930_v5, %s2613_s15  ;;  %1931 = vrot.lane.b32.xlu1 %v1929_v6, %s2613_s15 }
0x12f6   :  { %v2571_v13 = vpop.eup %2570 }
0x12f7   :  { %v2573_v17 = vpop.eup %2572  ;;  %v1897_v22 = vadd.f32 1.0, %v2571_v13 }
0x12f8   :  { %v1898_v23 = vadd.f32 1.0, %v2573_v17 }
0x12f9   :  { %2574 = vrcp.f32 %v1897_v22 }
0x12fa   :  { %2576 = vrcp.f32 %v1898_v23 }
0x1303   :  { %v2575_v24 = vpop.eup %2574 }
0x1304   :  { %v2577_v25 = vpop.eup %2576 }
0x135c   :  { %v1910_v27 = vpop.permute.xlu0 %1909  ;;  %v1908_v20 = vpop.permute.xlu1 %1907 }
0x135d   :  { %v1914_v29 = vmul.f32 %v2577_v25, %v1910_v27  ;;  %v1913_v30 = vmul.f32 %v2575_v24, %v1908_v20 }
0x135f   :  { %1919 = vrot.lane.b32.xlu0 %v1914_v29, %s2612_s2  ;;  %1917 = vrot.lane.b32.xlu1 %v1913_v30, %s2612_s2 }
0x1360   :  { %v1934_v16 = vpop.permute.xlu0 %1933  ;;  %v1932_v21 = vpop.permute.xlu1 %1931 }
0x1361   :  { %v1938_v31 = vmul.f32 %v1934_v16, %v2890_v48  ;;  %v1937_v59 = vmul.f32 %v1932_v21, %v2897_v52  ;;  %v1952_v48 = vld [vmem:[%s3107_s3 + $0xb8] sm:$0xff] }
0x1362   :  { %v2451_v52 = vpack.c.bf16 %v1952_v48, %v1951_v35 }
0x1363   :  { %1943 = vrot.lane.b32.xlu0 %v1938_v31, %s2612_s2  ;;  %1941 = vrot.lane.b32.xlu1 %v1937_v59, %s2612_s2 }
0x1364   :  { %2452 = vmatpush3.bf16.msra.mxu1 %v2451_v52 }
0x13d1   :  { %v1920_v36 = vpop.permute.xlu0 %1919  ;;  %v1918_v33 = vpop.permute.xlu1 %1917 }
0x13d2   :  { %v1924_v28 = vadd.f32 %v1920_v36, %v2881_v44  ;;  %v1923_v37 = vadd.f32 %v1918_v33, %v2884_v47  ;;  %v807_v47 = vsub.s32 5, %v2668_v10 }
0x13d4   :  { %2578 = vtanh.f32 %v1924_v28 }
0x13d5   :  { %2580 = vtanh.f32 %v1923_v37  ;;  %v1944_v15 = vpop.permute.xlu0 %1943  ;;  %v1942_v42 = vpop.permute.xlu1 %1941 }
0x13de   :  { %v2579_v38 = vpop.eup %2578 }
0x13df   :  { %v2581_v39 = vpop.eup %2580  ;;  %v1928_v14 = vmul.f32 %v2579_v38, %v2887_v1  ;;  %v2582_v1 = vld [vmem:[%s3109_s5] sm:$0x3f] }
0x13e0   :  { %v1927_v40 = vmul.f32 %v2581_v39, %v2894_v51  ;;  %v808_v19 = vrot.slane %v2582_v1, %v807_v47 }
0x13e1   :  { %v1948_v41 = vadd.f32 %v1944_v15, %v1928_v14 }
0x13e2   :  { %v1947_v43 = vadd.f32 %v1942_v42, %v1927_v40 }
0x13e3   :  { %v1956_v18 = vrot.slane %v1948_v41, 6 }
0x13e4   :  { %v1955_v45 = vrot.slane %v1947_v43, 7 }
0x13e6   :  { %v1957_v46 = vsel %vm484_vm2, %v1956_v18, %v1955_v45 }
0x13e7   :  { %1958 = vrot.lane.b32.xlu1 %v1957_v46, %s2613_s15 }
0x1459   :  { %v1959_v44 = vpop.permute.xlu1 %1958 }
0x145a   :  { %2345 = vmatmul.mubr.msk.f32.vlgmr.msra.gmra.mrb[2].mxu1 %vm115_vm0, %v1959_v44 }
0x152d   :  { %v2028_v51 = vpop.f32.mrb[2].mxu1 }
0x152e   :  { %v2453_v3 = vadd.f32 %v2028_v51, %v808_v19  ;;  %v2346_v49 = vpop.f32.mrb[3].mxu1 }
0x1530   :  { %v2033_v50 = vmax.f32 %v2453_v3, 0.0 }
0x1532   :  { %2035 = vst.msk [vmem:[#allocation2] sm:$0x3] %vm2034_vm4, %v2033_v50 }
0x1533   :  { %2594 = shalt.err (!%p2591_p4)
}
0x1534   :  { %s2595_s5 = scalar_lea.hbm %s3110_s6, 32 }
0x1535   :  { %p2596_p5 = scmp.ne.s32.totalorder %s3110_s6, %s2595_s5  ;;  %p2599_p6 = scmp.lt.u32.totalorder %s2595_s5, %s3110_s6 }
0x1537   :  { %p2601_p7 = pnand %p2599_p6, %p2596_p5 }
0x1539   :  { %2604 = shalt.err (!%p2601_p7)
}
0x153a   :  { %2045 = dma.vmem_to_hbm [thread:$0]  %s2043_s25, 32, %s3110_s6, [#allocation3]  }
0x153b   :  { %2605 = dma.done.wait [#allocation3], 32  }
0x153c   :  { %2606 = vsyncadd [#allocation3], 4294967264 }
0x153d   :  { %2049 = vsyncpa [#allocation3], 1 }

</bundles_post_ra>
